<compile_context>
chip_gen: v5e
topology: v5e:2x2
jax: 0.10.0
libtpu: 0.0.40
codegen_flags: <defaults>
</compile_context>

<pallas_src>
import jax
import jax.numpy as jnp
from jax.experimental import pallas as pl
from jax.experimental.pallas import tpu as pltpu


# ----------------------------------------------------------------------------
# Fused Pallas kernel: all LSTM layers + Linear(H->1) + Sigmoid
# ----------------------------------------------------------------------------
def make_fused_lstm_kernel(num_layers, T, H):
    """Build the fused kernel for a static (num_layers, T, H) configuration.

    Ref order (pallas_call convention: inputs..., outputs...):
      x_ref                      (T, I)
      [wih_t, whh_t, b] * L      (in_l, 4H), (H, 4H), (1, 4H)   per layer
      wlin_ref                   (1, H)
      blin_ref                   (1, 1)
      out_ref                    (1, 1)
    """

    def kernel(*refs):
        x_ref = refs[0]
        wlin_ref = refs[1 + 3 * num_layers]
        blin_ref = refs[2 + 3 * num_layers]
        out_ref = refs[3 + 3 * num_layers]

        # Layer input starts as the raw sequence; after each intermediate
        # layer it is the register-resident (T, H) stack of hidden states.
        layer_in = x_ref[...]                                   # (T, in_0)

        h = None
        for l in range(num_layers):
            wih_ref = refs[1 + 3 * l]      # (in_l, 4H)   = W_ih^T
            whh_ref = refs[2 + 3 * l]      # (H, 4H)      = W_hh^T
            b_ref = refs[3 + 3 * l]        # (1, 4H)      = b_ih + b_hh

            # Hoisted input projection for ALL timesteps at once:
            # one (T, in) @ (in, 4H) MXU matmul + bias, off the serial path.
            # (At T=8, 4H=128 this is exactly one vreg; if T or 4H grow past a
            #  vreg, stage gates_x in VMEM and read rows via pl.ds instead.)
            gates_x = (
                jnp.dot(layer_in, wih_ref[...],
                        preferred_element_type=jnp.float32)
                + b_ref[...]
            )                                                   # (T, 4H)
            whh = whh_ref[...]                                  # (H, 4H)

            h = jnp.zeros((1, H), jnp.float32)
            c = jnp.zeros((1, H), jnp.float32)
            last_layer = (l == num_layers - 1)
            h_steps = []   # register-resident per-step hidden states

            # Fully unrolled recurrence (T is small and static).
            for t in range(T):
                # TODO(synk): replace with RHS-stationary MXU driving
                # (matmul_push_rhs once per layer, acc_lhs/pop per step).
                gates = gates_x[t:t + 1, :] + jnp.dot(
                    h, whh, preferred_element_type=jnp.float32)  # (1, 4H)

                # sigmoid over the full 4H vector (i, f, o slices all used);
                # tanh only over the 32-lane g slice (saves EUP work on the
                # serial chain).  PyTorch gate order: i, f, g, o.
                sig = jax.nn.sigmoid(gates)
                i_g = sig[:, 0:H]
                f_g = sig[:, H:2 * H]
                o_g = sig[:, 3 * H:4 * H]
                g_g = jnp.tanh(gates[:, 2 * H:3 * H])

                c = f_g * c + i_g * g_g
                h = o_g * jnp.tanh(c)

                # Only intermediate layers need the full sequence (input to the
                # next layer's batched matmul); the last layer only keeps h.
                if not last_layer:
                    h_steps.append(h)

            if not last_layer:
                # (T, H) next-layer input assembled in registers — no VMEM
                # round trip, no masked stores.
                layer_in = jnp.concatenate(h_steps, axis=0)

        # Fused head: Linear(H -> 1) + Sigmoid on the last hidden state.
        logit = jnp.sum(h * wlin_ref[...], axis=-1, keepdims=True) + blin_ref[...]
        out_ref[...] = jax.nn.sigmoid(logit)

    return kernel


# ----------------------------------------------------------------------------
# Wrapper
# ----------------------------------------------------------------------------
def _fused_forward_call(x, prepared):
    T, _ = x.shape
    num_layers = len(prepared["w_ih_t"])
    H = prepared["w_hh_t"][0].shape[0]

    inputs = [x]
    for l in range(num_layers):
        inputs += [prepared["w_ih_t"][l], prepared["w_hh_t"][l], prepared["b"][l]]
    inputs += [prepared["w_lin"], prepared["b_lin"]]

    vmem = pltpu.MemorySpace.VMEM
    kernel = make_fused_lstm_kernel(num_layers, T, H)
    return pl.pallas_call(
        kernel,
        out_shape=jax.ShapeDtypeStruct((1, 1), jnp.float32),
        in_specs=[pl.BlockSpec(memory_space=vmem) for _ in inputs],
        out_specs=pl.BlockSpec(memory_space=vmem),
    )(*inputs)


def prepare_params(params):
    """One-time (outside jit) layout prep: transpose weights, fuse biases."""
    num_layers = len(params["w_ih"])
    prepared = {
        "w_ih_t": [jnp.asarray(params["w_ih"][l].T) for l in range(num_layers)],
        "w_hh_t": [jnp.asarray(params["w_hh"][l].T) for l in range(num_layers)],
        "b": [
            jnp.asarray((params["b_ih"][l] + params["b_hh"][l]).reshape(1, -1))
            for l in range(num_layers)
        ],
        "w_lin": jnp.asarray(params["w_lin"]),
        "b_lin": jnp.asarray(params["b_lin"]),
    }
    return prepared


@jax.jit
def simple_lstm_forward(x, prepared_params):
    out = _fused_forward_call(x, prepared_params)   # (1, 1)
    return out.reshape(1,)                          # matches torch shape (1,)


# ----------------------------------------------------------------------------
# Pure-JAX reference (for correctness check)
# ----------------------------------------------------------------------------
def simple_lstm_reference(x, params, num_layers, hidden):
    cur = x
    for l in range(num_layers):
        w_ih, w_hh = params["w_ih"][l], params["w_hh"][l]
        b_ih, b_hh = params["b_ih"][l], params["b_hh"][l]
        h = jnp.zeros((hidden,), jnp.float32)
        c = jnp.zeros((hidden,), jnp.float32)
        outs = []
        for t in range(cur.shape[0]):
            gates = w_ih @ cur[t] + b_ih + w_hh @ h + b_hh
            i = jax.nn.sigmoid(gates[:hidden])
            f = jax.nn.sigmoid(gates[hidden:2 * hidden])
            g = jnp.tanh(gates[2 * hidden:3 * hidden])
            o = jax.nn.sigmoid(gates[3 * hidden:])
            c = f * c + i * g
            h = o * jnp.tanh(c)
            outs.append(h)
        cur = jnp.stack(outs)
    logit = params["w_lin"][0] @ cur[-1] + params["b_lin"][0, 0]
    return jax.nn.sigmoid(logit).reshape(1,)


# ----------------------------------------------------------------------------
# Parameter init (deterministic, PyTorch-style uniform(-1/sqrt(H), 1/sqrt(H)))
# ----------------------------------------------------------------------------
def init_params(key, input_size, hidden, num_layers, lstm_bias, linear_bias):
    k = 1.0 / jnp.sqrt(hidden)
    params = {"w_ih": [], "w_hh": [], "b_ih": [], "b_hh": []}
    for l in range(num_layers):
        in_feats = input_size if l == 0 else hidden
        key, k1, k2, k3, k4 = jax.random.split(key, 5)
        params["w_ih"].append(
            jax.random.uniform(k1, (4 * hidden, in_feats), jnp.float32, -k, k))
        params["w_hh"].append(
            jax.random.uniform(k2, (4 * hidden, hidden), jnp.float32, -k, k))
        if lstm_bias:
            params["b_ih"].append(
                jax.random.uniform(k3, (4 * hidden,), jnp.float32, -k, k))
            params["b_hh"].append(
                jax.random.uniform(k4, (4 * hidden,), jnp.float32, -k, k))
        else:
            params["b_ih"].append(jnp.zeros((4 * hidden,), jnp.float32))
            params["b_hh"].append(jnp.zeros((4 * hidden,), jnp.float32))
    key, k5, k6 = jax.random.split(key, 3)
    params["w_lin"] = jax.random.uniform(k5, (1, hidden), jnp.float32, -k, k)
    params["b_lin"] = (
        jax.random.uniform(k6, (1, 1), jnp.float32, -k, k)
        if linear_bias else jnp.zeros((1, 1), jnp.float32))
    return params


# ----------------------------------------------------------------------------
# Main
# ----------------------------------------------------------------------------
if __name__ == "__main__":
    config = {
        "lstm_hiddenSize": 32,
        "lstm_numLayers": 2,
        "lstm_bias": True,
        "lstm_dropoutProbability": 0.0,   # eval mode -> dropout is a no-op
        "lstm_bidirectional": False,
        "linear_bias": True,
    }
    seq_len, input_size = 8, 16
    hidden = config["lstm_hiddenSize"]
    num_layers = config["lstm_numLayers"]

    key = jax.random.PRNGKey(0)
    key, xk, pk = jax.random.split(key, 3)
    x = jax.random.normal(xk, (seq_len, input_size), jnp.float32)
    params = init_params(pk, input_size, hidden, num_layers,
                         config["lstm_bias"], config["linear_bias"])

    prepared = prepare_params(params)   # one-time layout prep, outside jit

    out = simple_lstm_forward(x, prepared)
    out = jax.block_until_ready(out)

    ref = simple_lstm_reference(x, params, num_layers, hidden)
    assert out.shape == (1,), out.shape
    assert jnp.allclose(out, ref, atol=1e-5, rtol=1e-5), (out, ref)

    print("KERNEL_OK")
</pallas_src>

<mosaic_0001>
module attributes {stable_mosaic.version = 11 : i64} {
  func.func @kernel(%arg0: memref<8x16xf32, #tpu.memory_space<vmem>>, %arg1: memref<16x128xf32, #tpu.memory_space<vmem>>, %arg2: memref<32x128xf32, #tpu.memory_space<vmem>>, %arg3: memref<1x128xf32, #tpu.memory_space<vmem>>, %arg4: memref<32x128xf32, #tpu.memory_space<vmem>>, %arg5: memref<32x128xf32, #tpu.memory_space<vmem>>, %arg6: memref<1x128xf32, #tpu.memory_space<vmem>>, %arg7: memref<1x32xf32, #tpu.memory_space<vmem>>, %arg8: memref<1x1xf32, #tpu.memory_space<vmem>>, %arg9: memref<1x1xf32, #tpu.memory_space<vmem>>) attributes {dimension_semantics = [], scalar_prefetch = 0 : i64, scratch_operands = 0 : i64, tpu.core_type = #tpu.core_type<tc>} {
    %c0 = arith.constant 0 : index
    %c0_0 = arith.constant 0 : index
    %0 = vector.load %arg0[%c0, %c0_0] : memref<8x16xf32, #tpu.memory_space<vmem>>, vector<8x16xf32>
    %c0_1 = arith.constant 0 : index
    %c0_2 = arith.constant 0 : index
    %1 = vector.load %arg1[%c0_1, %c0_2] : memref<16x128xf32, #tpu.memory_space<vmem>>, vector<16x128xf32>
    %cst = arith.constant dense<0.000000e+00> : vector<8x128xf32>
    %2 = tpu.matmul %0, %1, %cst {dimension_numbers = #tpu.dot_dimension_numbers<[1], [0], [0], [1], [0, 0, 1, 1], [], []>} : vector<8x16xf32>, vector<16x128xf32>, vector<8x128xf32> -> vector<8x128xf32>
    %c0_3 = arith.constant 0 : index
    %c0_4 = arith.constant 0 : index
    %3 = vector.load %arg3[%c0_3, %c0_4] : memref<1x128xf32, #tpu.memory_space<vmem>>, vector<1x128xf32>
    %4 = vector.broadcast %3 : vector<1x128xf32> to vector<8x128xf32>
    %5 = arith.addf %2, %4 : vector<8x128xf32>
    %c0_5 = arith.constant 0 : index
    %c0_6 = arith.constant 0 : index
    %6 = vector.load %arg2[%c0_5, %c0_6] : memref<32x128xf32, #tpu.memory_space<vmem>>, vector<32x128xf32>
    %cst_7 = arith.constant 0.000000e+00 : f32
    %7 = vector.broadcast %cst_7 : f32 to vector<1x32xf32>
    %cst_8 = arith.constant 0.000000e+00 : f32
    %8 = vector.broadcast %cst_8 : f32 to vector<1x32xf32>
    %9 = vector.extract_strided_slice %5 {offsets = [0, 0], sizes = [1, 128], strides = [1, 1]} : vector<8x128xf32> to vector<1x128xf32>
    %cst_9 = arith.constant dense<0.000000e+00> : vector<1x128xf32>
    %10 = tpu.matmul %7, %6, %cst_9 {dimension_numbers = #tpu.dot_dimension_numbers<[1], [0], [0], [1], [0, 0, 1, 1], [], []>} : vector<1x32xf32>, vector<32x128xf32>, vector<1x128xf32> -> vector<1x128xf32>
    %11 = arith.addf %9, %10 : vector<1x128xf32>
    %12 = arith.negf %11 : vector<1x128xf32>
    %13 = math.exp %12 : vector<1x128xf32>
    %cst_10 = arith.constant 1.000000e+00 : f32
    %14 = vector.broadcast %cst_10 : f32 to vector<1x128xf32>
    %15 = arith.addf %14, %13 : vector<1x128xf32>
    %16 = arith.divf %14, %15 : vector<1x128xf32>
    %17 = vector.extract_strided_slice %16 {offsets = [0, 0], sizes = [1, 32], strides = [1, 1]} : vector<1x128xf32> to vector<1x32xf32>
    %18 = vector.extract_strided_slice %16 {offsets = [0, 32], sizes = [1, 32], strides = [1, 1]} : vector<1x128xf32> to vector<1x32xf32>
    %19 = vector.extract_strided_slice %16 {offsets = [0, 96], sizes = [1, 32], strides = [1, 1]} : vector<1x128xf32> to vector<1x32xf32>
    %20 = vector.extract_strided_slice %11 {offsets = [0, 64], sizes = [1, 32], strides = [1, 1]} : vector<1x128xf32> to vector<1x32xf32>
    %21 = math.tanh %20 : vector<1x32xf32>
    %22 = arith.mulf %18, %8 : vector<1x32xf32>
    %23 = arith.mulf %17, %21 : vector<1x32xf32>
    %24 = arith.addf %22, %23 : vector<1x32xf32>
    %25 = math.tanh %24 : vector<1x32xf32>
    %26 = arith.mulf %19, %25 : vector<1x32xf32>
    %27 = vector.extract_strided_slice %5 {offsets = [1, 0], sizes = [1, 128], strides = [1, 1]} : vector<8x128xf32> to vector<1x128xf32>
    %cst_11 = arith.constant dense<0.000000e+00> : vector<1x128xf32>
    %28 = tpu.matmul %26, %6, %cst_11 {dimension_numbers = #tpu.dot_dimension_numbers<[1], [0], [0], [1], [0, 0, 1, 1], [], []>} : vector<1x32xf32>, vector<32x128xf32>, vector<1x128xf32> -> vector<1x128xf32>
    %29 = arith.addf %27, %28 : vector<1x128xf32>
    %30 = arith.negf %29 : vector<1x128xf32>
    %31 = math.exp %30 : vector<1x128xf32>
    %cst_12 = arith.constant 1.000000e+00 : f32
    %32 = vector.broadcast %cst_12 : f32 to vector<1x128xf32>
    %33 = arith.addf %32, %31 : vector<1x128xf32>
    %34 = arith.divf %32, %33 : vector<1x128xf32>
    %35 = vector.extract_strided_slice %34 {offsets = [0, 0], sizes = [1, 32], strides = [1, 1]} : vector<1x128xf32> to vector<1x32xf32>
    %36 = vector.extract_strided_slice %34 {offsets = [0, 32], sizes = [1, 32], strides = [1, 1]} : vector<1x128xf32> to vector<1x32xf32>
    %37 = vector.extract_strided_slice %34 {offsets = [0, 96], sizes = [1, 32], strides = [1, 1]} : vector<1x128xf32> to vector<1x32xf32>
    %38 = vector.extract_strided_slice %29 {offsets = [0, 64], sizes = [1, 32], strides = [1, 1]} : vector<1x128xf32> to vector<1x32xf32>
    %39 = math.tanh %38 : vector<1x32xf32>
    %40 = arith.mulf %36, %24 : vector<1x32xf32>
    %41 = arith.mulf %35, %39 : vector<1x32xf32>
    %42 = arith.addf %40, %41 : vector<1x32xf32>
    %43 = math.tanh %42 : vector<1x32xf32>
    %44 = arith.mulf %37, %43 : vector<1x32xf32>
    %45 = vector.extract_strided_slice %5 {offsets = [2, 0], sizes = [1, 128], strides = [1, 1]} : vector<8x128xf32> to vector<1x128xf32>
    %cst_13 = arith.constant dense<0.000000e+00> : vector<1x128xf32>
    %46 = tpu.matmul %44, %6, %cst_13 {dimension_numbers = #tpu.dot_dimension_numbers<[1], [0], [0], [1], [0, 0, 1, 1], [], []>} : vector<1x32xf32>, vector<32x128xf32>, vector<1x128xf32> -> vector<1x128xf32>
    %47 = arith.addf %45, %46 : vector<1x128xf32>
    %48 = arith.negf %47 : vector<1x128xf32>
    %49 = math.exp %48 : vector<1x128xf32>
    %cst_14 = arith.constant 1.000000e+00 : f32
    %50 = vector.broadcast %cst_14 : f32 to vector<1x128xf32>
    %51 = arith.addf %50, %49 : vector<1x128xf32>
    %52 = arith.divf %50, %51 : vector<1x128xf32>
    %53 = vector.extract_strided_slice %52 {offsets = [0, 0], sizes = [1, 32], strides = [1, 1]} : vector<1x128xf32> to vector<1x32xf32>
    %54 = vector.extract_strided_slice %52 {offsets = [0, 32], sizes = [1, 32], strides = [1, 1]} : vector<1x128xf32> to vector<1x32xf32>
    %55 = vector.extract_strided_slice %52 {offsets = [0, 96], sizes = [1, 32], strides = [1, 1]} : vector<1x128xf32> to vector<1x32xf32>
    %56 = vector.extract_strided_slice %47 {offsets = [0, 64], sizes = [1, 32], strides = [1, 1]} : vector<1x128xf32> to vector<1x32xf32>
    %57 = math.tanh %56 : vector<1x32xf32>
    %58 = arith.mulf %54, %42 : vector<1x32xf32>
    %59 = arith.mulf %53, %57 : vector<1x32xf32>
    %60 = arith.addf %58, %59 : vector<1x32xf32>
    %61 = math.tanh %60 : vector<1x32xf32>
    %62 = arith.mulf %55, %61 : vector<1x32xf32>
    %63 = vector.extract_strided_slice %5 {offsets = [3, 0], sizes = [1, 128], strides = [1, 1]} : vector<8x128xf32> to vector<1x128xf32>
    %cst_15 = arith.constant dense<0.000000e+00> : vector<1x128xf32>
    %64 = tpu.matmul %62, %6, %cst_15 {dimension_numbers = #tpu.dot_dimension_numbers<[1], [0], [0], [1], [0, 0, 1, 1], [], []>} : vector<1x32xf32>, vector<32x128xf32>, vector<1x128xf32> -> vector<1x128xf32>
    %65 = arith.addf %63, %64 : vector<1x128xf32>
    %66 = arith.negf %65 : vector<1x128xf32>
    %67 = math.exp %66 : vector<1x128xf32>
    %cst_16 = arith.constant 1.000000e+00 : f32
    %68 = vector.broadcast %cst_16 : f32 to vector<1x128xf32>
    %69 = arith.addf %68, %67 : vector<1x128xf32>
    %70 = arith.divf %68, %69 : vector<1x128xf32>
    %71 = vector.extract_strided_slice %70 {offsets = [0, 0], sizes = [1, 32], strides = [1, 1]} : vector<1x128xf32> to vector<1x32xf32>
    %72 = vector.extract_strided_slice %70 {offsets = [0, 32], sizes = [1, 32], strides = [1, 1]} : vector<1x128xf32> to vector<1x32xf32>
    %73 = vector.extract_strided_slice %70 {offsets = [0, 96], sizes = [1, 32], strides = [1, 1]} : vector<1x128xf32> to vector<1x32xf32>
    %74 = vector.extract_strided_slice %65 {offsets = [0, 64], sizes = [1, 32], strides = [1, 1]} : vector<1x128xf32> to vector<1x32xf32>
    %75 = math.tanh %74 : vector<1x32xf32>
    %76 = arith.mulf %72, %60 : vector<1x32xf32>
    %77 = arith.mulf %71, %75 : vector<1x32xf32>
    %78 = arith.addf %76, %77 : vector<1x32xf32>
    %79 = math.tanh %78 : vector<1x32xf32>
    %80 = arith.mulf %73, %79 : vector<1x32xf32>
    %81 = vector.extract_strided_slice %5 {offsets = [4, 0], sizes = [1, 128], strides = [1, 1]} : vector<8x128xf32> to vector<1x128xf32>
    %cst_17 = arith.constant dense<0.000000e+00> : vector<1x128xf32>
    %82 = tpu.matmul %80, %6, %cst_17 {dimension_numbers = #tpu.dot_dimension_numbers<[1], [0], [0], [1], [0, 0, 1, 1], [], []>} : vector<1x32xf32>, vector<32x128xf32>, vector<1x128xf32> -> vector<1x128xf32>
    %83 = arith.addf %81, %82 : vector<1x128xf32>
    %84 = arith.negf %83 : vector<1x128xf32>
    %85 = math.exp %84 : vector<1x128xf32>
    %cst_18 = arith.constant 1.000000e+00 : f32
    %86 = vector.broadcast %cst_18 : f32 to vector<1x128xf32>
    %87 = arith.addf %86, %85 : vector<1x128xf32>
    %88 = arith.divf %86, %87 : vector<1x128xf32>
    %89 = vector.extract_strided_slice %88 {offsets = [0, 0], sizes = [1, 32], strides = [1, 1]} : vector<1x128xf32> to vector<1x32xf32>
    %90 = vector.extract_strided_slice %88 {offsets = [0, 32], sizes = [1, 32], strides = [1, 1]} : vector<1x128xf32> to vector<1x32xf32>
    %91 = vector.extract_strided_slice %88 {offsets = [0, 96], sizes = [1, 32], strides = [1, 1]} : vector<1x128xf32> to vector<1x32xf32>
    %92 = vector.extract_strided_slice %83 {offsets = [0, 64], sizes = [1, 32], strides = [1, 1]} : vector<1x128xf32> to vector<1x32xf32>
    %93 = math.tanh %92 : vector<1x32xf32>
    %94 = arith.mulf %90, %78 : vector<1x32xf32>
    %95 = arith.mulf %89, %93 : vector<1x32xf32>
    %96 = arith.addf %94, %95 : vector<1x32xf32>
    %97 = math.tanh %96 : vector<1x32xf32>
    %98 = arith.mulf %91, %97 : vector<1x32xf32>
    %99 = vector.extract_strided_slice %5 {offsets = [5, 0], sizes = [1, 128], strides = [1, 1]} : vector<8x128xf32> to vector<1x128xf32>
    %cst_19 = arith.constant dense<0.000000e+00> : vector<1x128xf32>
    %100 = tpu.matmul %98, %6, %cst_19 {dimension_numbers = #tpu.dot_dimension_numbers<[1], [0], [0], [1], [0, 0, 1, 1], [], []>} : vector<1x32xf32>, vector<32x128xf32>, vector<1x128xf32> -> vector<1x128xf32>
    %101 = arith.addf %99, %100 : vector<1x128xf32>
    %102 = arith.negf %101 : vector<1x128xf32>
    %103 = math.exp %102 : vector<1x128xf32>
    %cst_20 = arith.constant 1.000000e+00 : f32
    %104 = vector.broadcast %cst_20 : f32 to vector<1x128xf32>
    %105 = arith.addf %104, %103 : vector<1x128xf32>
    %106 = arith.divf %104, %105 : vector<1x128xf32>
    %107 = vector.extract_strided_slice %106 {offsets = [0, 0], sizes = [1, 32], strides = [1, 1]} : vector<1x128xf32> to vector<1x32xf32>
    %108 = vector.extract_strided_slice %106 {offsets = [0, 32], sizes = [1, 32], strides = [1, 1]} : vector<1x128xf32> to vector<1x32xf32>
    %109 = vector.extract_strided_slice %106 {offsets = [0, 96], sizes = [1, 32], strides = [1, 1]} : vector<1x128xf32> to vector<1x32xf32>
    %110 = vector.extract_strided_slice %101 {offsets = [0, 64], sizes = [1, 32], strides = [1, 1]} : vector<1x128xf32> to vector<1x32xf32>
    %111 = math.tanh %110 : vector<1x32xf32>
    %112 = arith.mulf %108, %96 : vector<1x32xf32>
    %113 = arith.mulf %107, %111 : vector<1x32xf32>
    %114 = arith.addf %112, %113 : vector<1x32xf32>
    %115 = math.tanh %114 : vector<1x32xf32>
    %116 = arith.mulf %109, %115 : vector<1x32xf32>
    %117 = vector.extract_strided_slice %5 {offsets = [6, 0], sizes = [1, 128], strides = [1, 1]} : vector<8x128xf32> to vector<1x128xf32>
    %cst_21 = arith.constant dense<0.000000e+00> : vector<1x128xf32>
    %118 = tpu.matmul %116, %6, %cst_21 {dimension_numbers = #tpu.dot_dimension_numbers<[1], [0], [0], [1], [0, 0, 1, 1], [], []>} : vector<1x32xf32>, vector<32x128xf32>, vector<1x128xf32> -> vector<1x128xf32>
    %119 = arith.addf %117, %118 : vector<1x128xf32>
    %120 = arith.negf %119 : vector<1x128xf32>
    %121 = math.exp %120 : vector<1x128xf32>
    %cst_22 = arith.constant 1.000000e+00 : f32
    %122 = vector.broadcast %cst_22 : f32 to vector<1x128xf32>
    %123 = arith.addf %122, %121 : vector<1x128xf32>
    %124 = arith.divf %122, %123 : vector<1x128xf32>
    %125 = vector.extract_strided_slice %124 {offsets = [0, 0], sizes = [1, 32], strides = [1, 1]} : vector<1x128xf32> to vector<1x32xf32>
    %126 = vector.extract_strided_slice %124 {offsets = [0, 32], sizes = [1, 32], strides = [1, 1]} : vector<1x128xf32> to vector<1x32xf32>
    %127 = vector.extract_strided_slice %124 {offsets = [0, 96], sizes = [1, 32], strides = [1, 1]} : vector<1x128xf32> to vector<1x32xf32>
    %128 = vector.extract_strided_slice %119 {offsets = [0, 64], sizes = [1, 32], strides = [1, 1]} : vector<1x128xf32> to vector<1x32xf32>
    %129 = math.tanh %128 : vector<1x32xf32>
    %130 = arith.mulf %126, %114 : vector<1x32xf32>
    %131 = arith.mulf %125, %129 : vector<1x32xf32>
    %132 = arith.addf %130, %131 : vector<1x32xf32>
    %133 = math.tanh %132 : vector<1x32xf32>
    %134 = arith.mulf %127, %133 : vector<1x32xf32>
    %135 = vector.extract_strided_slice %5 {offsets = [7, 0], sizes = [1, 128], strides = [1, 1]} : vector<8x128xf32> to vector<1x128xf32>
    %cst_23 = arith.constant dense<0.000000e+00> : vector<1x128xf32>
    %136 = tpu.matmul %134, %6, %cst_23 {dimension_numbers = #tpu.dot_dimension_numbers<[1], [0], [0], [1], [0, 0, 1, 1], [], []>} : vector<1x32xf32>, vector<32x128xf32>, vector<1x128xf32> -> vector<1x128xf32>
    %137 = arith.addf %135, %136 : vector<1x128xf32>
    %138 = arith.negf %137 : vector<1x128xf32>
    %139 = math.exp %138 : vector<1x128xf32>
    %cst_24 = arith.constant 1.000000e+00 : f32
    %140 = vector.broadcast %cst_24 : f32 to vector<1x128xf32>
    %141 = arith.addf %140, %139 : vector<1x128xf32>
    %142 = arith.divf %140, %141 : vector<1x128xf32>
    %143 = vector.extract_strided_slice %142 {offsets = [0, 0], sizes = [1, 32], strides = [1, 1]} : vector<1x128xf32> to vector<1x32xf32>
    %144 = vector.extract_strided_slice %142 {offsets = [0, 32], sizes = [1, 32], strides = [1, 1]} : vector<1x128xf32> to vector<1x32xf32>
    %145 = vector.extract_strided_slice %142 {offsets = [0, 96], sizes = [1, 32], strides = [1, 1]} : vector<1x128xf32> to vector<1x32xf32>
    %146 = vector.extract_strided_slice %137 {offsets = [0, 64], sizes = [1, 32], strides = [1, 1]} : vector<1x128xf32> to vector<1x32xf32>
    %147 = math.tanh %146 : vector<1x32xf32>
    %148 = arith.mulf %144, %132 : vector<1x32xf32>
    %149 = arith.mulf %143, %147 : vector<1x32xf32>
    %150 = arith.addf %148, %149 : vector<1x32xf32>
    %151 = math.tanh %150 : vector<1x32xf32>
    %152 = arith.mulf %145, %151 : vector<1x32xf32>
    %153 = tpu.concatenate %26, %44, %62, %80, %98, %116, %134, %152 in 0 : vector<1x32xf32>, vector<1x32xf32>, vector<1x32xf32>, vector<1x32xf32>, vector<1x32xf32>, vector<1x32xf32>, vector<1x32xf32>, vector<1x32xf32> -> vector<8x32xf32>
    %c0_25 = arith.constant 0 : index
    %c0_26 = arith.constant 0 : index
    %154 = vector.load %arg4[%c0_25, %c0_26] : memref<32x128xf32, #tpu.memory_space<vmem>>, vector<32x128xf32>
    %cst_27 = arith.constant dense<0.000000e+00> : vector<8x128xf32>
    %155 = tpu.matmul %153, %154, %cst_27 {dimension_numbers = #tpu.dot_dimension_numbers<[1], [0], [0], [1], [0, 0, 1, 1], [], []>} : vector<8x32xf32>, vector<32x128xf32>, vector<8x128xf32> -> vector<8x128xf32>
    %c0_28 = arith.constant 0 : index
    %c0_29 = arith.constant 0 : index
    %156 = vector.load %arg6[%c0_28, %c0_29] : memref<1x128xf32, #tpu.memory_space<vmem>>, vector<1x128xf32>
    %157 = vector.broadcast %156 : vector<1x128xf32> to vector<8x128xf32>
    %158 = arith.addf %155, %157 : vector<8x128xf32>
    %c0_30 = arith.constant 0 : index
    %c0_31 = arith.constant 0 : index
    %159 = vector.load %arg5[%c0_30, %c0_31] : memref<32x128xf32, #tpu.memory_space<vmem>>, vector<32x128xf32>
    %cst_32 = arith.constant 0.000000e+00 : f32
    %160 = vector.broadcast %cst_32 : f32 to vector<1x32xf32>
    %cst_33 = arith.constant 0.000000e+00 : f32
    %161 = vector.broadcast %cst_33 : f32 to vector<1x32xf32>
    %162 = vector.extract_strided_slice %158 {offsets = [0, 0], sizes = [1, 128], strides = [1, 1]} : vector<8x128xf32> to vector<1x128xf32>
    %cst_34 = arith.constant dense<0.000000e+00> : vector<1x128xf32>
    %163 = tpu.matmul %160, %159, %cst_34 {dimension_numbers = #tpu.dot_dimension_numbers<[1], [0], [0], [1], [0, 0, 1, 1], [], []>} : vector<1x32xf32>, vector<32x128xf32>, vector<1x128xf32> -> vector<1x128xf32>
    %164 = arith.addf %162, %163 : vector<1x128xf32>
    %165 = arith.negf %164 : vector<1x128xf32>
    %166 = math.exp %165 : vector<1x128xf32>
    %cst_35 = arith.constant 1.000000e+00 : f32
    %167 = vector.broadcast %cst_35 : f32 to vector<1x128xf32>
    %168 = arith.addf %167, %166 : vector<1x128xf32>
    %169 = arith.divf %167, %168 : vector<1x128xf32>
    %170 = vector.extract_strided_slice %169 {offsets = [0, 0], sizes = [1, 32], strides = [1, 1]} : vector<1x128xf32> to vector<1x32xf32>
    %171 = vector.extract_strided_slice %169 {offsets = [0, 32], sizes = [1, 32], strides = [1, 1]} : vector<1x128xf32> to vector<1x32xf32>
    %172 = vector.extract_strided_slice %169 {offsets = [0, 96], sizes = [1, 32], strides = [1, 1]} : vector<1x128xf32> to vector<1x32xf32>
    %173 = vector.extract_strided_slice %164 {offsets = [0, 64], sizes = [1, 32], strides = [1, 1]} : vector<1x128xf32> to vector<1x32xf32>
    %174 = math.tanh %173 : vector<1x32xf32>
    %175 = arith.mulf %171, %161 : vector<1x32xf32>
    %176 = arith.mulf %170, %174 : vector<1x32xf32>
    %177 = arith.addf %175, %176 : vector<1x32xf32>
    %178 = math.tanh %177 : vector<1x32xf32>
    %179 = arith.mulf %172, %178 : vector<1x32xf32>
    %180 = vector.extract_strided_slice %158 {offsets = [1, 0], sizes = [1, 128], strides = [1, 1]} : vector<8x128xf32> to vector<1x128xf32>
    %cst_36 = arith.constant dense<0.000000e+00> : vector<1x128xf32>
    %181 = tpu.matmul %179, %159, %cst_36 {dimension_numbers = #tpu.dot_dimension_numbers<[1], [0], [0], [1], [0, 0, 1, 1], [], []>} : vector<1x32xf32>, vector<32x128xf32>, vector<1x128xf32> -> vector<1x128xf32>
    %182 = arith.addf %180, %181 : vector<1x128xf32>
    %183 = arith.negf %182 : vector<1x128xf32>
    %184 = math.exp %183 : vector<1x128xf32>
    %cst_37 = arith.constant 1.000000e+00 : f32
    %185 = vector.broadcast %cst_37 : f32 to vector<1x128xf32>
    %186 = arith.addf %185, %184 : vector<1x128xf32>
    %187 = arith.divf %185, %186 : vector<1x128xf32>
    %188 = vector.extract_strided_slice %187 {offsets = [0, 0], sizes = [1, 32], strides = [1, 1]} : vector<1x128xf32> to vector<1x32xf32>
    %189 = vector.extract_strided_slice %187 {offsets = [0, 32], sizes = [1, 32], strides = [1, 1]} : vector<1x128xf32> to vector<1x32xf32>
    %190 = vector.extract_strided_slice %187 {offsets = [0, 96], sizes = [1, 32], strides = [1, 1]} : vector<1x128xf32> to vector<1x32xf32>
    %191 = vector.extract_strided_slice %182 {offsets = [0, 64], sizes = [1, 32], strides = [1, 1]} : vector<1x128xf32> to vector<1x32xf32>
    %192 = math.tanh %191 : vector<1x32xf32>
    %193 = arith.mulf %189, %177 : vector<1x32xf32>
    %194 = arith.mulf %188, %192 : vector<1x32xf32>
    %195 = arith.addf %193, %194 : vector<1x32xf32>
    %196 = math.tanh %195 : vector<1x32xf32>
    %197 = arith.mulf %190, %196 : vector<1x32xf32>
    %198 = vector.extract_strided_slice %158 {offsets = [2, 0], sizes = [1, 128], strides = [1, 1]} : vector<8x128xf32> to vector<1x128xf32>
    %cst_38 = arith.constant dense<0.000000e+00> : vector<1x128xf32>
    %199 = tpu.matmul %197, %159, %cst_38 {dimension_numbers = #tpu.dot_dimension_numbers<[1], [0], [0], [1], [0, 0, 1, 1], [], []>} : vector<1x32xf32>, vector<32x128xf32>, vector<1x128xf32> -> vector<1x128xf32>
    %200 = arith.addf %198, %199 : vector<1x128xf32>
    %201 = arith.negf %200 : vector<1x128xf32>
    %202 = math.exp %201 : vector<1x128xf32>
    %cst_39 = arith.constant 1.000000e+00 : f32
    %203 = vector.broadcast %cst_39 : f32 to vector<1x128xf32>
    %204 = arith.addf %203, %202 : vector<1x128xf32>
    %205 = arith.divf %203, %204 : vector<1x128xf32>
    %206 = vector.extract_strided_slice %205 {offsets = [0, 0], sizes = [1, 32], strides = [1, 1]} : vector<1x128xf32> to vector<1x32xf32>
    %207 = vector.extract_strided_slice %205 {offsets = [0, 32], sizes = [1, 32], strides = [1, 1]} : vector<1x128xf32> to vector<1x32xf32>
    %208 = vector.extract_strided_slice %205 {offsets = [0, 96], sizes = [1, 32], strides = [1, 1]} : vector<1x128xf32> to vector<1x32xf32>
    %209 = vector.extract_strided_slice %200 {offsets = [0, 64], sizes = [1, 32], strides = [1, 1]} : vector<1x128xf32> to vector<1x32xf32>
    %210 = math.tanh %209 : vector<1x32xf32>
    %211 = arith.mulf %207, %195 : vector<1x32xf32>
    %212 = arith.mulf %206, %210 : vector<1x32xf32>
    %213 = arith.addf %211, %212 : vector<1x32xf32>
    %214 = math.tanh %213 : vector<1x32xf32>
    %215 = arith.mulf %208, %214 : vector<1x32xf32>
    %216 = vector.extract_strided_slice %158 {offsets = [3, 0], sizes = [1, 128], strides = [1, 1]} : vector<8x128xf32> to vector<1x128xf32>
    %cst_40 = arith.constant dense<0.000000e+00> : vector<1x128xf32>
    %217 = tpu.matmul %215, %159, %cst_40 {dimension_numbers = #tpu.dot_dimension_numbers<[1], [0], [0], [1], [0, 0, 1, 1], [], []>} : vector<1x32xf32>, vector<32x128xf32>, vector<1x128xf32> -> vector<1x128xf32>
    %218 = arith.addf %216, %217 : vector<1x128xf32>
    %219 = arith.negf %218 : vector<1x128xf32>
    %220 = math.exp %219 : vector<1x128xf32>
    %cst_41 = arith.constant 1.000000e+00 : f32
    %221 = vector.broadcast %cst_41 : f32 to vector<1x128xf32>
    %222 = arith.addf %221, %220 : vector<1x128xf32>
    %223 = arith.divf %221, %222 : vector<1x128xf32>
    %224 = vector.extract_strided_slice %223 {offsets = [0, 0], sizes = [1, 32], strides = [1, 1]} : vector<1x128xf32> to vector<1x32xf32>
    %225 = vector.extract_strided_slice %223 {offsets = [0, 32], sizes = [1, 32], strides = [1, 1]} : vector<1x128xf32> to vector<1x32xf32>
    %226 = vector.extract_strided_slice %223 {offsets = [0, 96], sizes = [1, 32], strides = [1, 1]} : vector<1x128xf32> to vector<1x32xf32>
    %227 = vector.extract_strided_slice %218 {offsets = [0, 64], sizes = [1, 32], strides = [1, 1]} : vector<1x128xf32> to vector<1x32xf32>
    %228 = math.tanh %227 : vector<1x32xf32>
    %229 = arith.mulf %225, %213 : vector<1x32xf32>
    %230 = arith.mulf %224, %228 : vector<1x32xf32>
    %231 = arith.addf %229, %230 : vector<1x32xf32>
    %232 = math.tanh %231 : vector<1x32xf32>
    %233 = arith.mulf %226, %232 : vector<1x32xf32>
    %234 = vector.extract_strided_slice %158 {offsets = [4, 0], sizes = [1, 128], strides = [1, 1]} : vector<8x128xf32> to vector<1x128xf32>
    %cst_42 = arith.constant dense<0.000000e+00> : vector<1x128xf32>
    %235 = tpu.matmul %233, %159, %cst_42 {dimension_numbers = #tpu.dot_dimension_numbers<[1], [0], [0], [1], [0, 0, 1, 1], [], []>} : vector<1x32xf32>, vector<32x128xf32>, vector<1x128xf32> -> vector<1x128xf32>
    %236 = arith.addf %234, %235 : vector<1x128xf32>
    %237 = arith.negf %236 : vector<1x128xf32>
    %238 = math.exp %237 : vector<1x128xf32>
    %cst_43 = arith.constant 1.000000e+00 : f32
    %239 = vector.broadcast %cst_43 : f32 to vector<1x128xf32>
    %240 = arith.addf %239, %238 : vector<1x128xf32>
    %241 = arith.divf %239, %240 : vector<1x128xf32>
    %242 = vector.extract_strided_slice %241 {offsets = [0, 0], sizes = [1, 32], strides = [1, 1]} : vector<1x128xf32> to vector<1x32xf32>
    %243 = vector.extract_strided_slice %241 {offsets = [0, 32], sizes = [1, 32], strides = [1, 1]} : vector<1x128xf32> to vector<1x32xf32>
    %244 = vector.extract_strided_slice %241 {offsets = [0, 96], sizes = [1, 32], strides = [1, 1]} : vector<1x128xf32> to vector<1x32xf32>
    %245 = vector.extract_strided_slice %236 {offsets = [0, 64], sizes = [1, 32], strides = [1, 1]} : vector<1x128xf32> to vector<1x32xf32>
    %246 = math.tanh %245 : vector<1x32xf32>
    %247 = arith.mulf %243, %231 : vector<1x32xf32>
    %248 = arith.mulf %242, %246 : vector<1x32xf32>
    %249 = arith.addf %247, %248 : vector<1x32xf32>
    %250 = math.tanh %249 : vector<1x32xf32>
    %251 = arith.mulf %244, %250 : vector<1x32xf32>
    %252 = vector.extract_strided_slice %158 {offsets = [5, 0], sizes = [1, 128], strides = [1, 1]} : vector<8x128xf32> to vector<1x128xf32>
    %cst_44 = arith.constant dense<0.000000e+00> : vector<1x128xf32>
    %253 = tpu.matmul %251, %159, %cst_44 {dimension_numbers = #tpu.dot_dimension_numbers<[1], [0], [0], [1], [0, 0, 1, 1], [], []>} : vector<1x32xf32>, vector<32x128xf32>, vector<1x128xf32> -> vector<1x128xf32>
    %254 = arith.addf %252, %253 : vector<1x128xf32>
    %255 = arith.negf %254 : vector<1x128xf32>
    %256 = math.exp %255 : vector<1x128xf32>
    %cst_45 = arith.constant 1.000000e+00 : f32
    %257 = vector.broadcast %cst_45 : f32 to vector<1x128xf32>
    %258 = arith.addf %257, %256 : vector<1x128xf32>
    %259 = arith.divf %257, %258 : vector<1x128xf32>
    %260 = vector.extract_strided_slice %259 {offsets = [0, 0], sizes = [1, 32], strides = [1, 1]} : vector<1x128xf32> to vector<1x32xf32>
    %261 = vector.extract_strided_slice %259 {offsets = [0, 32], sizes = [1, 32], strides = [1, 1]} : vector<1x128xf32> to vector<1x32xf32>
    %262 = vector.extract_strided_slice %259 {offsets = [0, 96], sizes = [1, 32], strides = [1, 1]} : vector<1x128xf32> to vector<1x32xf32>
    %263 = vector.extract_strided_slice %254 {offsets = [0, 64], sizes = [1, 32], strides = [1, 1]} : vector<1x128xf32> to vector<1x32xf32>
    %264 = math.tanh %263 : vector<1x32xf32>
    %265 = arith.mulf %261, %249 : vector<1x32xf32>
    %266 = arith.mulf %260, %264 : vector<1x32xf32>
    %267 = arith.addf %265, %266 : vector<1x32xf32>
    %268 = math.tanh %267 : vector<1x32xf32>
    %269 = arith.mulf %262, %268 : vector<1x32xf32>
    %270 = vector.extract_strided_slice %158 {offsets = [6, 0], sizes = [1, 128], strides = [1, 1]} : vector<8x128xf32> to vector<1x128xf32>
    %cst_46 = arith.constant dense<0.000000e+00> : vector<1x128xf32>
    %271 = tpu.matmul %269, %159, %cst_46 {dimension_numbers = #tpu.dot_dimension_numbers<[1], [0], [0], [1], [0, 0, 1, 1], [], []>} : vector<1x32xf32>, vector<32x128xf32>, vector<1x128xf32> -> vector<1x128xf32>
    %272 = arith.addf %270, %271 : vector<1x128xf32>
    %273 = arith.negf %272 : vector<1x128xf32>
    %274 = math.exp %273 : vector<1x128xf32>
    %cst_47 = arith.constant 1.000000e+00 : f32
    %275 = vector.broadcast %cst_47 : f32 to vector<1x128xf32>
    %276 = arith.addf %275, %274 : vector<1x128xf32>
    %277 = arith.divf %275, %276 : vector<1x128xf32>
    %278 = vector.extract_strided_slice %277 {offsets = [0, 0], sizes = [1, 32], strides = [1, 1]} : vector<1x128xf32> to vector<1x32xf32>
    %279 = vector.extract_strided_slice %277 {offsets = [0, 32], sizes = [1, 32], strides = [1, 1]} : vector<1x128xf32> to vector<1x32xf32>
    %280 = vector.extract_strided_slice %277 {offsets = [0, 96], sizes = [1, 32], strides = [1, 1]} : vector<1x128xf32> to vector<1x32xf32>
    %281 = vector.extract_strided_slice %272 {offsets = [0, 64], sizes = [1, 32], strides = [1, 1]} : vector<1x128xf32> to vector<1x32xf32>
    %282 = math.tanh %281 : vector<1x32xf32>
    %283 = arith.mulf %279, %267 : vector<1x32xf32>
    %284 = arith.mulf %278, %282 : vector<1x32xf32>
    %285 = arith.addf %283, %284 : vector<1x32xf32>
    %286 = math.tanh %285 : vector<1x32xf32>
    %287 = arith.mulf %280, %286 : vector<1x32xf32>
    %288 = vector.extract_strided_slice %158 {offsets = [7, 0], sizes = [1, 128], strides = [1, 1]} : vector<8x128xf32> to vector<1x128xf32>
    %cst_48 = arith.constant dense<0.000000e+00> : vector<1x128xf32>
    %289 = tpu.matmul %287, %159, %cst_48 {dimension_numbers = #tpu.dot_dimension_numbers<[1], [0], [0], [1], [0, 0, 1, 1], [], []>} : vector<1x32xf32>, vector<32x128xf32>, vector<1x128xf32> -> vector<1x128xf32>
    %290 = arith.addf %288, %289 : vector<1x128xf32>
    %291 = arith.negf %290 : vector<1x128xf32>
    %292 = math.exp %291 : vector<1x128xf32>
    %cst_49 = arith.constant 1.000000e+00 : f32
    %293 = vector.broadcast %cst_49 : f32 to vector<1x128xf32>
    %294 = arith.addf %293, %292 : vector<1x128xf32>
    %295 = arith.divf %293, %294 : vector<1x128xf32>
    %296 = vector.extract_strided_slice %295 {offsets = [0, 0], sizes = [1, 32], strides = [1, 1]} : vector<1x128xf32> to vector<1x32xf32>
    %297 = vector.extract_strided_slice %295 {offsets = [0, 32], sizes = [1, 32], strides = [1, 1]} : vector<1x128xf32> to vector<1x32xf32>
    %298 = vector.extract_strided_slice %295 {offsets = [0, 96], sizes = [1, 32], strides = [1, 1]} : vector<1x128xf32> to vector<1x32xf32>
    %299 = vector.extract_strided_slice %290 {offsets = [0, 64], sizes = [1, 32], strides = [1, 1]} : vector<1x128xf32> to vector<1x32xf32>
    %300 = math.tanh %299 : vector<1x32xf32>
    %301 = arith.mulf %297, %285 : vector<1x32xf32>
    %302 = arith.mulf %296, %300 : vector<1x32xf32>
    %303 = arith.addf %301, %302 : vector<1x32xf32>
    %304 = math.tanh %303 : vector<1x32xf32>
    %305 = arith.mulf %298, %304 : vector<1x32xf32>
    %c0_50 = arith.constant 0 : index
    %c0_51 = arith.constant 0 : index
    %306 = vector.load %arg7[%c0_50, %c0_51] : memref<1x32xf32, #tpu.memory_space<vmem>>, vector<1x32xf32>
    %307 = arith.mulf %305, %306 : vector<1x32xf32>
    %cst_52 = arith.constant dense<0.000000e+00> : vector<1xf32>
    %308 = vector.multi_reduction <add>, %307, %cst_52 [1] : vector<1x32xf32> to vector<1xf32>
    %309 = vector.shape_cast %308 : vector<1xf32> to vector<1x1xf32>
    %c0_53 = arith.constant 0 : index
    %c0_54 = arith.constant 0 : index
    %310 = vector.load %arg8[%c0_53, %c0_54] : memref<1x1xf32, #tpu.memory_space<vmem>>, vector<1x1xf32>
    %311 = arith.addf %309, %310 : vector<1x1xf32>
    %312 = arith.negf %311 : vector<1x1xf32>
    %313 = math.exp %312 : vector<1x1xf32>
    %cst_55 = arith.constant 1.000000e+00 : f32
    %314 = vector.broadcast %cst_55 : f32 to vector<1x1xf32>
    %315 = arith.addf %314, %313 : vector<1x1xf32>
    %316 = arith.divf %314, %315 : vector<1x1xf32>
    %c0_56 = arith.constant 0 : index
    %c0_57 = arith.constant 0 : index
    %317 = vector.load %arg9[%c0_56, %c0_57] : memref<1x1xf32, #tpu.memory_space<vmem>>, vector<1x1xf32>
    tpu.vector_store %arg9[%c0_56, %c0_57], %316 {strides = array<i32>} : memref<1x1xf32, #tpu.memory_space<vmem>>, vector<1x1xf32>,
    return
  }
}

</mosaic_0001>

<bundles_post_ra>
// kernel: simple_lstm_forward.1
= control target key start
LH: loop header
LB: loop body
LE: loop exit
PB: predicated region body
PF: predicated region fallthrough
CT: control target
= control target key end

     0   :  { %s1888_s0 = inlined_call_operand.hbm [shape: f32[8,16], index: 0, kind: input, shape index: {}]   ;;  %s1889_s1 = inlined_call_operand.hbm [shape: f32[16,128], index: 1, kind: input, shape index: {}]   ;;  %s1890_s2 = inlined_call_operand.hbm [shape: f32[32,128], index: 2, kind: input, shape index: {}]   ;;  %s1891_s3 = inlined_call_operand.vmem [shape: f32[1,128], index: 3, kind: input, shape index: {}]   ;;  %s1892_s4 = inlined_call_operand.hbm [shape: f32[32,128], index: 4, kind: input, shape index: {}]   ;;  %s1893_s5 = inlined_call_operand.hbm [shape: f32[32,128], index: 5, kind: input, shape index: {}]   ;;  %s1894_s6 = inlined_call_operand.vmem [shape: f32[1,128], index: 6, kind: input, shape index: {}]   ;;  %s1895_s7 = inlined_call_operand.vmem [shape: f32[1,32], index: 7, kind: input, shape index: {}]   ;;  %s1896_s8 = inlined_call_operand.<no memory space> [shape: f32[1,1], index: 8, kind: input, shape index: {}]   ;;  %s1897_s9 = inlined_call_operand.hbm [shape: f32[1,1], index: 9, kind: output, shape index: {}]  }
   0x1   :  { %v14_v0 = vstv %s1896_s8 }
   0x2   :  { %15 = vst [vmem:[#allocation2] sm:$0x1] %v14_v0 }
   0x3   :  { %16 = vsyncpa [#allocation4], 0 }
   0x4   :  { %17 = vsyncpa [#allocation7], 0 }
   0x5   :  { %18 = vsyncpa [#allocation10], 0  ;;  %s35_s13 = sshll.u32 %s1889_s1, 4  ;;  %s36_s13 = int_to_ptr.hbm [resolvable:$true] %s35_s13 }
   0x6   :  { %19 = vsyncpa [#allocation5], 0  ;;  %s1688_s14 = smov [#allocation6]   ;;  %s63_s18 = sshll.u32 %s1892_s4, 4  ;;  %s64_s18 = int_to_ptr.hbm [resolvable:$true] %s63_s18 }
   0x7   :  { %s37_s15 = sshll.u32 %s1688_s14, 4  ;;  %s1689_s19 = smov 128   ;;  %s38_s15 = int_to_ptr.vmem [resolvable:$true] %s37_s15 }
   0x8   :  { %s1690_s20 = smov 8   ;;  %s1691_s8 = smov [#allocation9]  }
   0x9   :  { %43 = dma.hbm_to_vmem [thread:$0]  %s36_s13, 256, %s38_s15, [#allocation7], %s1689_s19, %s1689_s19, %s1690_s20  }
   0xa   :  { %s65_s21 = sshll.u32 %s1691_s8, 4  ;;  %s25_s24 = sshll.u32 %s1888_s0, 4  ;;  %s66_s21 = int_to_ptr.vmem [resolvable:$true] %s65_s21  ;;  %s26_s24 = int_to_ptr.hbm [resolvable:$true] %s25_s24 }
   0xb   :  { %71 = dma.hbm_to_vmem [thread:$0]  %s64_s18, 512, %s66_s21, [#allocation10], %s1689_s19, %s1689_s19, %s1690_s20  }
   0xc   :  { %s48_s26 = sshll.u32 %s1890_s2, 4  ;;  %s1692_s27 = smov [#allocation3]   ;;  %s49_s26 = int_to_ptr.hbm [resolvable:$true] %s48_s26 }
   0xd   :  { %s27_s28 = sshll.u32 %s1692_s27, 4  ;;  %s1693_s4 = smov [#allocation8]   ;;  %s28_s28 = int_to_ptr.vmem [resolvable:$true] %s27_s28 }
   0xe   :  { %30 = dma.hbm_to_vmem [thread:$0]  %s26_s24, 128, %s28_s28, [#allocation4]  }
   0xf   :  { %s50_s29 = sshll.u32 %s1693_s4, 4  ;;  %s76_s11 = sshll.u32 %s1893_s5, 4  ;;  %s51_s29 = int_to_ptr.vmem [resolvable:$true] %s50_s29  ;;  %s77_s11 = int_to_ptr.hbm [resolvable:$true] %s76_s11 }
  0x10   :  { %56 = dma.hbm_to_vmem [thread:$0]  %s49_s26, 512, %s51_s29, [#allocation7], %s1689_s19, %s1689_s19, %s1690_s20  }
  0x11   :  { %s1694_s0 = smov [#allocation11]  }
  0x12   :  { %s78_s12 = sshll.u32 %s1694_s0, 4  ;;  %s79_s12 = int_to_ptr.vmem [resolvable:$true] %s78_s12 }
  0x13   :  { %84 = dma.hbm_to_vmem [thread:$0]  %s77_s11, 512, %s79_s12, [#allocation10], %s1689_s19, %s1689_s19, %s1690_s20  }
  0x14   :  { %1680 = dma.done.wait [#allocation4], 128  }
  0x15   :  { %1681 = vsyncadd [#allocation4], 4294967168 }
  0x16   :  { %1682 = dma.done.wait [#allocation7], 768  }
  0x17   :  { %1683 = vsyncadd [#allocation7], 4294966528 }
  0x18   :  { %1684 = dma.done.wait [#allocation10], 1024  }
  0x19   :  { %1685 = vsyncadd [#allocation10], 4294966272  ;;  %v145_v1 = vld [vmem:[#allocation8 + $0x18] sm:$0xff]  ;;  %v144_v3 = vld [vmem:[#allocation8 + $0x10] sm:$0xff]  ;;  %vm118_vm0 = vcmask 130048   ;;  %v1695_v8 = vmov 0.0  }
  0x1a   :  { %v113_v2 = vld [vmem:[#allocation6 + $0x8] sm:$0xff]  ;;  %162 = vmatpush.msra.mxu1 %v145_v1  ;;  %v112_v4 = vld [vmem:[#allocation6] sm:$0xff]  ;;  %v111_v5 = vld [vmem:[#allocation3] sm:$0xff]  ;;  %225 = vmatpush.msra.mxu2 %v145_v1  ;;  %s1696_s13 = smov 64   ;;  %vm146_vm5 = vcmask 261120   ;;  %vm697_vm14 = vcmask 1040384  }
  0x1b   :  { %136 = vmatpush.msra.mxu0 %v113_v2  ;;  %v143_v6 = vld [vmem:[#allocation8 + $0x8] sm:$0xff]  ;;  %295 = vmatpush.msra.mxu3 %v145_v1  ;;  %v142_v7 = vld [vmem:[#allocation8] sm:$0xff]  ;;  %vm699_vm15 = vcmask 1041408   ;;  %s1698_s17 = smov 96   ;;  %s1343_s8 = sshll.u32 %s1897_s9, 4  ;;  %s1344_s8 = int_to_ptr.hbm [resolvable:$true] %s1343_s8 }
  0x1c   :  { %163 = vmatpush.msra.mxu1 %v144_v3  ;;  %226 = vmatpush.msra.mxu2 %v144_v3  ;;  %v1400_v9 = vld [vmem:[%s1891_s3] ss:$0 sm:$0xff]  ;;  %s1697_s3 = smov 32  }
  0x1d   :  { %137 = vmatpush.msra.mxu0 %v112_v4  ;;  %296 = vmatpush.msra.mxu3 %v144_v3 }
  0x1e   :  { %1355 = vmatmul.msk.f32.vlgmr.msra.gmra.mxu0 %vm118_vm0, %v111_v5  ;;  %164 = vmatpush.msra.mxu1 %v143_v6 }
  0x1f   :  { %227 = vmatpush.msra.mxu2 %v143_v6  ;;  %365 = vmatpush.msrb.mxu0 %v145_v1 }
  0x20   :  { %165 = vmatpush.msra.mxu1 %v142_v7  ;;  %297 = vmatpush.msra.mxu3 %v143_v6 }
  0x21   :  { %166 = vmatmul.f32.vlgmr.msra.gmra.mxu1 %v1695_v8  ;;  %228 = vmatpush.msra.mxu2 %v142_v7 }
  0x22   :  { %298 = vmatpush.msra.mxu3 %v142_v7  ;;  %366 = vmatpush.msrb.mxu0 %v144_v3 }
  0x23   :  { %435 = vmatpush.msrb.mxu1 %v145_v1  ;;  %505 = vmatpush.msrb.mxu2 %v145_v1 }
  0x24   :  { %367 = vmatpush.msrb.mxu0 %v143_v6  ;;  %575 = vmatpush.msrb.mxu3 %v145_v1 }
  0x25   :  { %436 = vmatpush.msrb.mxu1 %v144_v3  ;;  %506 = vmatpush.msrb.mxu2 %v144_v3 }
  0x26   :  { %368 = vmatpush.msrb.mxu0 %v142_v7  ;;  %576 = vmatpush.msrb.mxu3 %v144_v3 }
  0x27   :  { %437 = vmatpush.msrb.mxu1 %v143_v6  ;;  %507 = vmatpush.msrb.mxu2 %v143_v6 }
  0x28   :  { %577 = vmatpush.msrb.mxu3 %v143_v6  ;;  %645 = vmatpush.msra.mxu0 %v145_v1 }
  0x29   :  { %438 = vmatpush.msrb.mxu1 %v142_v7  ;;  %508 = vmatpush.msrb.mxu2 %v142_v7 }
  0x2a   :  { %578 = vmatpush.msrb.mxu3 %v142_v7  ;;  %646 = vmatpush.msra.mxu0 %v144_v3 }
  0x2c   :  { %647 = vmatpush.msra.mxu0 %v143_v6 }
  0x2e   :  { %648 = vmatpush.msra.mxu0 %v142_v7 }
  0x9b   :  { %v139_v10 = vpop.f32.mrf.mxu0 }
  0x9c   :  { %v1772_v11 = vadd.f32 %v1400_v9, %v139_v10 }
  0x9e   :  { %v167_v12 = vpop.f32.mrf.mxu1 }
  0x9f   :  { %v170_v13 = vadd.f32 %v167_v12, %v1772_v11 }
  0xa1   :  { %1404 = vtanh.f32 %v170_v13  ;;  %v1356_v15 = vmul.f32 -1.442695, %v170_v13 }
  0xa3   :  { %1406 = vpow2.f32 %v1356_v15 }
  0xa7   :  { %v1405_v14 = vpop.eup %1404 }
  0xa8   :  { %193 = vrot.lane.b32.xlu0 %v1405_v14, %s1696_s13 }
  0xa9   :  { %v1407_v16 = vpop.eup %1406 }
  0xaa   :  { %v174_v17 = vadd.f32 1.0, %v1407_v16 }
  0xac   :  { %1408 = vrcp.f32 %v174_v17  ;;  %v186_v23 = vand.u32 2147483648, %v174_v17  ;;  %vm180_vm2 = vweird.f32 %v174_v17  ;;  %v184_v24 = vand.u32 2147483647, %v174_v17 }
  0xae   :  { %v187_v26 = vor.u32 1.1754944e-38, %v186_v23  ;;  %vm185_vm4 = vcmp.eq.f32.partialorder %v184_v24, 8.507059e+37 }
  0xb2   :  { %v1409_v18 = vpop.eup %1408 }
  0xb3   :  { %v176_v19 = vmul.f32 %v1409_v18, %v174_v17  ;;  %vm181_vm1 = vweird.f32 %v1409_v18 }
  0xb4   :  { %vm182_vm3 = vmor %vm180_vm2, %vm181_vm1 }
  0xb5   :  { %v177_v20 = vsub.f32 1.0, %v176_v19 }
  0xb7   :  { %v178_v21 = vmul.f32 %v1409_v18, %v177_v20 }
  0xb9   :  { %v179_v22 = vadd.f32 %v1409_v18, %v178_v21 }
  0xbb   :  { %v183_v25 = vsel %vm182_vm3, %v1409_v18, %v179_v22 }
  0xbc   :  { %v188_v28 = vsel %vm185_vm4, %v187_v26, %v183_v25  ;;  %vm701_vm4 = vcmask 1042432  }
  0xbd   :  { %v191_v30 = vmul.f32 0.0, %v188_v28 }
 0x11a   :  { %v194_v27 = vpop.permute.xlu0 %193 }
 0x11b   :  { %v196_v29 = vmul.f32 %v194_v27, %v188_v28 }
 0x11d   :  { %198 = vrot.lane.b32.xlu0 %v196_v29, %s1697_s3 }
 0x18f   :  { %v199_v31 = vpop.permute.xlu0 %198 }
 0x190   :  { %v201_v32 = vadd.f32 %v199_v31, %v191_v30 }
 0x192   :  { %1410 = vtanh.f32 %v201_v32  ;;  %v258_v56 = vrot.slane %v201_v32, 7 }
 0x198   :  { %v1411_v33 = vpop.eup %1410 }
 0x199   :  { %204 = vrot.lane.b32.xlu1 %v1411_v33, %s1696_s13 }
 0x20b   :  { %v205_v34 = vpop.permute.xlu1 %204 }
 0x20c   :  { %v1778_v35 = vmul.f32 %v205_v34, %v188_v28 }
 0x20e   :  { %209 = vrot.lane.b32.xlu1 %v1778_v35, %s1697_s3 }
 0x280   :  { %v210_v36 = vpop.permute.xlu1 %209 }
 0x281   :  { %1357 = vmatmul.msk.f32.vlgmr.msra.gmra.mxu2 %vm146_vm5, %v210_v36 }
 0x304   :  { %v230_v37 = vpop.f32.mrf.mxu2 }
 0x305   :  { %v234_v38 = vrot.slane %v230_v37, 7 }
 0x307   :  { %v236_v39 = vadd.f32 %v234_v38, %v1772_v11 }
 0x309   :  { %1412 = vtanh.f32 %v236_v39  ;;  %v1358_v41 = vmul.f32 -1.442695, %v236_v39 }
 0x30b   :  { %1414 = vpow2.f32 %v1358_v41 }
 0x30f   :  { %v1413_v40 = vpop.eup %1412 }
 0x310   :  { %262 = vrot.lane.b32.xlu2 %v1413_v40, %s1696_s13 }
 0x311   :  { %v1415_v42 = vpop.eup %1414 }
 0x312   :  { %v240_v43 = vadd.f32 1.0, %v1415_v42 }
 0x314   :  { %1416 = vrcp.f32 %v240_v43  ;;  %v252_v49 = vand.u32 2147483648, %v240_v43  ;;  %vm246_vm7 = vweird.f32 %v240_v43  ;;  %v250_v50 = vand.u32 2147483647, %v240_v43 }
 0x316   :  { %v253_v52 = vor.u32 1.1754944e-38, %v252_v49  ;;  %vm251_vm9 = vcmp.eq.f32.partialorder %v250_v50, 8.507059e+37 }
 0x31a   :  { %v1417_v44 = vpop.eup %1416 }
 0x31b   :  { %v242_v45 = vmul.f32 %v1417_v44, %v240_v43  ;;  %vm247_vm6 = vweird.f32 %v1417_v44 }
 0x31c   :  { %vm248_vm8 = vmor %vm246_vm7, %vm247_vm6 }
 0x31d   :  { %v243_v46 = vsub.f32 1.0, %v242_v45 }
 0x31f   :  { %v244_v47 = vmul.f32 %v1417_v44, %v243_v46 }
 0x321   :  { %v245_v48 = vadd.f32 %v1417_v44, %v244_v47 }
 0x323   :  { %v249_v51 = vsel %vm248_vm8, %v1417_v44, %v245_v48 }
 0x324   :  { %v254_v54 = vsel %vm251_vm9, %v253_v52, %v249_v51 }
 0x325   :  { %v260_v57 = vmul.f32 %v258_v56, %v254_v54 }
 0x36a   :  { %v263_v53 = vpop.permute.xlu2 %262 }
 0x36b   :  { %v265_v55 = vmul.f32 %v263_v53, %v254_v54 }
 0x36d   :  { %267 = vrot.lane.b32.xlu2 %v265_v55, %s1697_s3 }
 0x3c7   :  { %v268_v58 = vpop.permute.xlu2 %267 }
 0x3c8   :  { %v270_v59 = vadd.f32 %v268_v58, %v260_v57 }
 0x3ca   :  { %1418 = vtanh.f32 %v270_v59  ;;  %v328_v22 = vrot.slane %v270_v59, 7 }
 0x3d0   :  { %v1419_v60 = vpop.eup %1418 }
 0x3d1   :  { %273 = vrot.lane.b32.xlu0 %v1419_v60, %s1696_s13 }
 0x443   :  { %v274_v61 = vpop.permute.xlu0 %273 }
 0x444   :  { %v276_v62 = vmul.f32 %v274_v61, %v254_v54 }
 0x446   :  { %v278_v63 = vrot.slane %v276_v62, 1  ;;  %v698_v29 = vsel %vm697_vm14, %v1778_v35, %v276_v62 }
 0x448   :  { %279 = vrot.lane.b32.xlu1 %v278_v63, %s1697_s3 }
 0x4ba   :  { %v280_v0 = vpop.permute.xlu1 %279 }
 0x4bb   :  { %1359 = vmatmul.msk.f32.vlgmr.msra.gmra.mxu3 %vm146_vm5, %v280_v0 }
 0x53e   :  { %v300_v1 = vpop.f32.mrf.mxu3 }
 0x53f   :  { %v304_v2 = vrot.slane %v300_v1, 6 }
 0x541   :  { %v306_v3 = vadd.f32 %v304_v2, %v1772_v11 }
 0x543   :  { %1420 = vtanh.f32 %v306_v3  ;;  %v1360_v5 = vmul.f32 -1.442695, %v306_v3 }
 0x545   :  { %1422 = vpow2.f32 %v1360_v5 }
 0x549   :  { %v1421_v4 = vpop.eup %1420 }
 0x54a   :  { %332 = vrot.lane.b32.xlu2 %v1421_v4, %s1696_s13 }
 0x54b   :  { %v1423_v6 = vpop.eup %1422 }
 0x54c   :  { %v310_v7 = vadd.f32 1.0, %v1423_v6 }
 0x54e   :  { %1424 = vrcp.f32 %v310_v7  ;;  %v322_v15 = vand.u32 2147483648, %v310_v7  ;;  %vm316_vm11 = vweird.f32 %v310_v7  ;;  %v320_v16 = vand.u32 2147483647, %v310_v7 }
 0x550   :  { %v323_v18 = vor.u32 1.1754944e-38, %v322_v15  ;;  %vm321_vm13 = vcmp.eq.f32.partialorder %v320_v16, 8.507059e+37 }
 0x554   :  { %v1425_v9 = vpop.eup %1424 }
 0x555   :  { %v312_v10 = vmul.f32 %v1425_v9, %v310_v7  ;;  %vm317_vm10 = vweird.f32 %v1425_v9 }
 0x556   :  { %vm318_vm12 = vmor %vm316_vm11, %vm317_vm10  ;;  %vm703_vm10 = vcmask 1043456  }
 0x557   :  { %v313_v12 = vsub.f32 1.0, %v312_v10 }
 0x559   :  { %v314_v13 = vmul.f32 %v1425_v9, %v313_v12 }
 0x55b   :  { %v315_v14 = vadd.f32 %v1425_v9, %v314_v13 }
 0x55d   :  { %v319_v17 = vsel %vm318_vm12, %v1425_v9, %v315_v14 }
 0x55e   :  { %v324_v20 = vsel %vm321_vm13, %v323_v18, %v319_v17 }
 0x55f   :  { %v330_v23 = vmul.f32 %v328_v22, %v324_v20 }
 0x5a4   :  { %v333_v19 = vpop.permute.xlu2 %332 }
 0x5a5   :  { %v335_v21 = vmul.f32 %v333_v19, %v324_v20 }
 0x5a7   :  { %337 = vrot.lane.b32.xlu0 %v335_v21, %s1697_s3 }
 0x619   :  { %v338_v24 = vpop.permute.xlu0 %337 }
 0x61a   :  { %v340_v25 = vadd.f32 %v338_v24, %v330_v23 }
 0x61c   :  { %1426 = vtanh.f32 %v340_v25  ;;  %v398_v52 = vrot.slane %v340_v25, 7 }
 0x622   :  { %v1427_v26 = vpop.eup %1426 }
 0x623   :  { %343 = vrot.lane.b32.xlu1 %v1427_v26, %s1696_s13 }
 0x695   :  { %v344_v27 = vpop.permute.xlu1 %343 }
 0x696   :  { %v346_v28 = vmul.f32 %v344_v27, %v324_v20 }
 0x698   :  { %v348_v30 = vrot.slane %v346_v28, 2  ;;  %v700_v31 = vsel %vm699_vm15, %v698_v29, %v346_v28  ;;  %vm705_vm15 = vcmask 1044480  }
 0x69a   :  { %349 = vrot.lane.b32.xlu2 %v348_v30, %s1697_s3 }
 0x6f4   :  { %v350_v32 = vpop.permute.xlu2 %349 }
 0x6f5   :  { %1361 = vmatmul.msk.f32.vlgmr.msrb.gmra.mxu0 %vm146_vm5, %v350_v32 }
 0x772   :  { %v370_v33 = vpop.f32.mrf.mxu0 }
 0x773   :  { %v374_v34 = vrot.slane %v370_v33, 5 }
 0x775   :  { %v376_v36 = vadd.f32 %v374_v34, %v1772_v11 }
 0x777   :  { %1428 = vtanh.f32 %v376_v36  ;;  %v1362_v38 = vmul.f32 -1.442695, %v376_v36 }
 0x779   :  { %1430 = vpow2.f32 %v1362_v38 }
 0x77d   :  { %v1429_v37 = vpop.eup %1428 }
 0x77e   :  { %402 = vrot.lane.b32.xlu0 %v1429_v37, %s1696_s13 }
 0x77f   :  { %v1431_v39 = vpop.eup %1430 }
 0x780   :  { %v380_v40 = vadd.f32 1.0, %v1431_v39 }
 0x782   :  { %1432 = vrcp.f32 %v380_v40  ;;  %v392_v45 = vand.u32 2147483648, %v380_v40  ;;  %vm386_vm1 = vweird.f32 %v380_v40  ;;  %v390_v46 = vand.u32 2147483647, %v380_v40 }
 0x784   :  { %v393_v48 = vor.u32 1.1754944e-38, %v392_v45  ;;  %vm391_vm3 = vcmp.eq.f32.partialorder %v390_v46, 8.507059e+37 }
 0x788   :  { %v1433_v35 = vpop.eup %1432 }
 0x789   :  { %v382_v41 = vmul.f32 %v1433_v35, %v380_v40  ;;  %vm387_vm0 = vweird.f32 %v1433_v35 }
 0x78a   :  { %vm388_vm2 = vmor %vm386_vm1, %vm387_vm0 }
 0x78b   :  { %v383_v42 = vsub.f32 1.0, %v382_v41 }
 0x78d   :  { %v384_v43 = vmul.f32 %v1433_v35, %v383_v42 }
 0x78f   :  { %v385_v44 = vadd.f32 %v1433_v35, %v384_v43 }
 0x791   :  { %v389_v47 = vsel %vm388_vm2, %v1433_v35, %v385_v44 }
 0x792   :  { %v394_v50 = vsel %vm391_vm3, %v393_v48, %v389_v47 }
 0x793   :  { %v400_v53 = vmul.f32 %v398_v52, %v394_v50 }
 0x7f0   :  { %v403_v49 = vpop.permute.xlu0 %402 }
 0x7f1   :  { %v405_v51 = vmul.f32 %v403_v49, %v394_v50 }
 0x7f3   :  { %407 = vrot.lane.b32.xlu1 %v405_v51, %s1697_s3 }
 0x865   :  { %v408_v54 = vpop.permute.xlu1 %407 }
 0x866   :  { %v410_v55 = vadd.f32 %v408_v54, %v400_v53 }
 0x868   :  { %1434 = vtanh.f32 %v410_v55  ;;  %v468_v19 = vrot.slane %v410_v55, 7 }
 0x86e   :  { %v1435_v56 = vpop.eup %1434 }
 0x86f   :  { %413 = vrot.lane.b32.xlu2 %v1435_v56, %s1696_s13 }
 0x8c9   :  { %v414_v57 = vpop.permute.xlu2 %413 }
 0x8ca   :  { %v416_v58 = vmul.f32 %v414_v57, %v394_v50 }
 0x8cc   :  { %v418_v59 = vrot.slane %v416_v58, 3  ;;  %v702_v60 = vsel %vm701_vm4, %v700_v31, %v416_v58  ;;  %vm707_vm4 = vcmask 1045504  }
 0x8ce   :  { %419 = vrot.lane.b32.xlu0 %v418_v59, %s1697_s3 }
 0x940   :  { %v420_v61 = vpop.permute.xlu0 %419 }
 0x941   :  { %1363 = vmatmul.msk.f32.vlgmr.msrb.gmra.mxu1 %vm146_vm5, %v420_v61 }
 0x9be   :  { %v440_v62 = vpop.f32.mrf.mxu1 }
 0x9bf   :  { %v444_v63 = vrot.slane %v440_v62, 4 }
 0x9c1   :  { %v446_v0 = vadd.f32 %v444_v63, %v1772_v11 }
 0x9c3   :  { %1436 = vtanh.f32 %v446_v0  ;;  %v1364_v2 = vmul.f32 -1.442695, %v446_v0 }
 0x9c5   :  { %1438 = vpow2.f32 %v1364_v2 }
 0x9c9   :  { %v1437_v1 = vpop.eup %1436 }
 0x9ca   :  { %472 = vrot.lane.b32.xlu1 %v1437_v1, %s1696_s13 }
 0x9cb   :  { %v1439_v3 = vpop.eup %1438 }
 0x9cc   :  { %v450_v4 = vadd.f32 1.0, %v1439_v3 }
 0x9ce   :  { %1440 = vrcp.f32 %v450_v4  ;;  %v462_v12 = vand.u32 2147483648, %v450_v4  ;;  %vm456_vm7 = vweird.f32 %v450_v4  ;;  %v460_v13 = vand.u32 2147483647, %v450_v4 }
 0x9d0   :  { %v463_v15 = vor.u32 1.1754944e-38, %v462_v12  ;;  %vm461_vm9 = vcmp.eq.f32.partialorder %v460_v13, 8.507059e+37 }
 0x9d4   :  { %v1441_v5 = vpop.eup %1440 }
 0x9d5   :  { %v452_v6 = vmul.f32 %v1441_v5, %v450_v4  ;;  %vm457_vm6 = vweird.f32 %v1441_v5 }
 0x9d6   :  { %vm458_vm8 = vmor %vm456_vm7, %vm457_vm6 }
 0x9d7   :  { %v453_v7 = vsub.f32 1.0, %v452_v6 }
 0x9d9   :  { %v454_v9 = vmul.f32 %v1441_v5, %v453_v7 }
 0x9db   :  { %v455_v10 = vadd.f32 %v1441_v5, %v454_v9 }
 0x9dd   :  { %v459_v14 = vsel %vm458_vm8, %v1441_v5, %v455_v10 }
 0x9de   :  { %v464_v17 = vsel %vm461_vm9, %v463_v15, %v459_v14 }
 0x9df   :  { %v470_v20 = vmul.f32 %v468_v19, %v464_v17 }
 0xa3c   :  { %v473_v16 = vpop.permute.xlu1 %472 }
 0xa3d   :  { %v475_v18 = vmul.f32 %v473_v16, %v464_v17 }
 0xa3f   :  { %477 = vrot.lane.b32.xlu2 %v475_v18, %s1697_s3 }
 0xa99   :  { %v478_v21 = vpop.permute.xlu2 %477 }
 0xa9a   :  { %v480_v22 = vadd.f32 %v478_v21, %v470_v20 }
 0xa9c   :  { %1442 = vtanh.f32 %v480_v22  ;;  %v538_v48 = vrot.slane %v480_v22, 7 }
 0xaa2   :  { %v1443_v23 = vpop.eup %1442 }
 0xaa3   :  { %483 = vrot.lane.b32.xlu0 %v1443_v23, %s1696_s13 }
 0xb15   :  { %v484_v24 = vpop.permute.xlu0 %483 }
 0xb16   :  { %v486_v25 = vmul.f32 %v484_v24, %v464_v17 }
 0xb18   :  { %v488_v26 = vrot.slane %v486_v25, 4  ;;  %v704_v27 = vsel %vm703_vm10, %v702_v60, %v486_v25  ;;  %vm709_vm10 = vcmask 1046528  }
 0xb1a   :  { %489 = vrot.lane.b32.xlu1 %v488_v26, %s1697_s3 }
 0xb8c   :  { %v490_v28 = vpop.permute.xlu1 %489 }
 0xb8d   :  { %1365 = vmatmul.msk.f32.vlgmr.msrb.gmra.mxu2 %vm146_vm5, %v490_v28 }
 0xc10   :  { %v510_v29 = vpop.f32.mrf.mxu2 }
 0xc11   :  { %v514_v30 = vrot.slane %v510_v29, 3 }
 0xc13   :  { %v516_v31 = vadd.f32 %v514_v30, %v1772_v11 }
 0xc15   :  { %1444 = vtanh.f32 %v516_v31  ;;  %v1366_v33 = vmul.f32 -1.442695, %v516_v31 }
 0xc17   :  { %1446 = vpow2.f32 %v1366_v33 }
 0xc1b   :  { %v1445_v32 = vpop.eup %1444 }
 0xc1c   :  { %542 = vrot.lane.b32.xlu2 %v1445_v32, %s1696_s13 }
 0xc1d   :  { %v1447_v34 = vpop.eup %1446 }
 0xc1e   :  { %v520_v36 = vadd.f32 1.0, %v1447_v34 }
 0xc20   :  { %1448 = vrcp.f32 %v520_v36  ;;  %v532_v41 = vand.u32 2147483648, %v520_v36  ;;  %vm526_vm12 = vweird.f32 %v520_v36  ;;  %v530_v42 = vand.u32 2147483647, %v520_v36 }
 0xc22   :  { %v533_v44 = vor.u32 1.1754944e-38, %v532_v41  ;;  %vm531_vm14 = vcmp.eq.f32.partialorder %v530_v42, 8.507059e+37 }
 0xc26   :  { %v1449_v37 = vpop.eup %1448 }
 0xc27   :  { %v522_v38 = vmul.f32 %v1449_v37, %v520_v36  ;;  %vm527_vm11 = vweird.f32 %v1449_v37 }
 0xc28   :  { %vm528_vm13 = vmor %vm526_vm12, %vm527_vm11 }
 0xc29   :  { %v523_v39 = vsub.f32 1.0, %v522_v38 }
 0xc2b   :  { %v524_v40 = vmul.f32 %v1449_v37, %v523_v39 }
 0xc2d   :  { %v525_v35 = vadd.f32 %v1449_v37, %v524_v40 }
 0xc2f   :  { %v529_v43 = vsel %vm528_vm13, %v1449_v37, %v525_v35 }
 0xc30   :  { %v534_v46 = vsel %vm531_vm14, %v533_v44, %v529_v43 }
 0xc31   :  { %v540_v49 = vmul.f32 %v538_v48, %v534_v46  ;;  %v747_v48 = vld [vmem:[#allocation11 + $0x18] sm:$0xff] }
 0xc32   :  { %760 = vmatpush.msra.mxu2 %v747_v48  ;;  %823 = vmatpush.msra.mxu3 %v747_v48 }
 0xc33   :  { %893 = vmatpush.msrb.mxu0 %v747_v48 }
 0xc76   :  { %v543_v45 = vpop.permute.xlu2 %542 }
 0xc77   :  { %v545_v47 = vmul.f32 %v543_v45, %v534_v46 }
 0xc79   :  { %547 = vrot.lane.b32.xlu0 %v545_v47, %s1697_s3 }
 0xceb   :  { %v548_v50 = vpop.permute.xlu0 %547 }
 0xcec   :  { %v550_v51 = vadd.f32 %v548_v50, %v540_v49  ;;  %v746_v49 = vld [vmem:[#allocation11 + $0x10] sm:$0xff]  ;;  %v714_v50 = vld [vmem:[#allocation9 + $0x18] sm:$0xff] }
 0xced   :  { %736 = vmatpush.msra.mxu1 %v714_v50  ;;  %761 = vmatpush.msra.mxu2 %v746_v49 }
 0xcee   :  { %1450 = vtanh.f32 %v550_v51  ;;  %v608_v15 = vrot.slane %v550_v51, 7  ;;  %v713_v51 = vld [vmem:[#allocation9 + $0x10] sm:$0xff]  ;;  %824 = vmatpush.msra.mxu3 %v746_v49  ;;  %894 = vmatpush.msrb.mxu0 %v746_v49 }
 0xcef   :  { %737 = vmatpush.msra.mxu1 %v713_v51 }
 0xcf4   :  { %v1451_v52 = vpop.eup %1450 }
 0xcf5   :  { %553 = vrot.lane.b32.xlu1 %v1451_v52, %s1696_s13  ;;  %v745_v52 = vld [vmem:[#allocation11 + $0x8] sm:$0xff] }
 0xcf6   :  { %762 = vmatpush.msra.mxu2 %v745_v52  ;;  %825 = vmatpush.msra.mxu3 %v745_v52 }
 0xcf7   :  { %895 = vmatpush.msrb.mxu0 %v745_v52 }
 0xd67   :  { %v554_v53 = vpop.permute.xlu1 %553 }
 0xd68   :  { %v556_v54 = vmul.f32 %v554_v53, %v534_v46  ;;  %v712_v53 = vld [vmem:[#allocation9 + $0x8] sm:$0xff] }
 0xd69   :  { %738 = vmatpush.msra.mxu1 %v712_v53 }
 0xd6a   :  { %v558_v55 = vrot.slane %v556_v54, 5  ;;  %v706_v56 = vsel %vm705_vm15, %v704_v27, %v556_v54  ;;  %v744_v54 = vld [vmem:[#allocation11] sm:$0xff] }
 0xd6b   :  { %763 = vmatpush.msra.mxu2 %v744_v54  ;;  %826 = vmatpush.msra.mxu3 %v744_v54 }
 0xd6c   :  { %559 = vrot.lane.b32.xlu2 %v558_v55, %s1697_s3  ;;  %v711_v55 = vld [vmem:[#allocation9] sm:$0xff]  ;;  %764 = vmatmul.f32.vlgmr.msra.gmra.mxu2 %v1695_v8 }
 0xd6d   :  { %739 = vmatpush.msra.mxu1 %v711_v55  ;;  %896 = vmatpush.msrb.mxu0 %v744_v54 }
 0xd6e   :  { %1033 = vmatpush.msrb.mxu2 %v747_v48 }
 0xd6f   :  { %963 = vmatpush.msrb.mxu1 %v747_v48 }
 0xd70   :  { %1034 = vmatpush.msrb.mxu2 %v746_v49 }
 0xd71   :  { %964 = vmatpush.msrb.mxu1 %v746_v49 }
 0xd72   :  { %1035 = vmatpush.msrb.mxu2 %v745_v52 }
 0xd73   :  { %965 = vmatpush.msrb.mxu1 %v745_v52 }
 0xd74   :  { %1036 = vmatpush.msrb.mxu2 %v744_v54 }
 0xd75   :  { %966 = vmatpush.msrb.mxu1 %v744_v54 }
 0xdc6   :  { %v560_v57 = vpop.permute.xlu2 %559 }
 0xdc7   :  { %1367 = vmatmul.msk.f32.vlgmr.msrb.gmra.mxu3 %vm146_vm5, %v560_v57 }
 0xdc8   :  { %1103 = vmatpush.msrb.mxu3 %v747_v48 }
 0xdca   :  { %1104 = vmatpush.msrb.mxu3 %v746_v49 }
 0xdcc   :  { %1105 = vmatpush.msrb.mxu3 %v745_v52 }
 0xdce   :  { %1106 = vmatpush.msrb.mxu3 %v744_v54 }
 0xe4a   :  { %v580_v58 = vpop.f32.mrf.mxu3 }
 0xe4b   :  { %v584_v59 = vrot.slane %v580_v58, 2 }
 0xe4d   :  { %v586_v60 = vadd.f32 %v584_v59, %v1772_v11  ;;  %v1401_v59 = vld [vmem:[%s1894_s6] ss:$0 sm:$0xff] }
 0xe4f   :  { %1452 = vtanh.f32 %v586_v60  ;;  %v1368_v62 = vmul.f32 -1.442695, %v586_v60 }
 0xe51   :  { %1454 = vpow2.f32 %v1368_v62 }
 0xe55   :  { %v1453_v61 = vpop.eup %1452 }
 0xe56   :  { %612 = vrot.lane.b32.xlu0 %v1453_v61, %s1696_s13  ;;  %v765_v61 = vpop.f32.mrf.mxu2 }
 0xe57   :  { %v1455_v63 = vpop.eup %1454 }
 0xe58   :  { %v590_v0 = vadd.f32 1.0, %v1455_v63 }
 0xe5a   :  { %1456 = vrcp.f32 %v590_v0  ;;  %v602_v6 = vand.u32 2147483648, %v590_v0  ;;  %vm596_vm1 = vweird.f32 %v590_v0  ;;  %v600_v7 = vand.u32 2147483647, %v590_v0 }
 0xe5c   :  { %v603_v10 = vor.u32 1.1754944e-38, %v602_v6  ;;  %vm601_vm3 = vcmp.eq.f32.partialorder %v600_v7, 8.507059e+37 }
 0xe60   :  { %v1457_v1 = vpop.eup %1456 }
 0xe61   :  { %v592_v2 = vmul.f32 %v1457_v1, %v590_v0  ;;  %vm597_vm0 = vweird.f32 %v1457_v1 }
 0xe62   :  { %vm598_vm2 = vmor %vm596_vm1, %vm597_vm0 }
 0xe63   :  { %v593_v3 = vsub.f32 1.0, %v592_v2 }
 0xe65   :  { %v594_v4 = vmul.f32 %v1457_v1, %v593_v3 }
 0xe67   :  { %v595_v5 = vadd.f32 %v1457_v1, %v594_v4 }
 0xe69   :  { %v599_v9 = vsel %vm598_vm2, %v1457_v1, %v595_v5 }
 0xe6a   :  { %v604_v13 = vsel %vm601_vm3, %v603_v10, %v599_v9 }
 0xe6b   :  { %v610_v16 = vmul.f32 %v608_v15, %v604_v13 }
 0xec8   :  { %v613_v12 = vpop.permute.xlu0 %612 }
 0xec9   :  { %v615_v14 = vmul.f32 %v613_v12, %v604_v13 }
 0xecb   :  { %617 = vrot.lane.b32.xlu1 %v615_v14, %s1697_s3 }
 0xf3d   :  { %v618_v17 = vpop.permute.xlu1 %617 }
 0xf3e   :  { %v620_v18 = vadd.f32 %v618_v17, %v610_v16 }
 0xf40   :  { %1458 = vtanh.f32 %v620_v18  ;;  %v678_v43 = vrot.slane %v620_v18, 7 }
 0xf46   :  { %v1459_v19 = vpop.eup %1458 }
 0xf47   :  { %623 = vrot.lane.b32.xlu2 %v1459_v19, %s1696_s13 }
 0xfa1   :  { %v624_v20 = vpop.permute.xlu2 %623 }
 0xfa2   :  { %v626_v21 = vmul.f32 %v624_v20, %v604_v13 }
 0xfa4   :  { %v628_v22 = vrot.slane %v626_v21, 6  ;;  %v1818_v23 = vsel %vm707_vm4, %v706_v56, %v626_v21 }
 0xfa6   :  { %629 = vrot.lane.b32.xlu0 %v628_v22, %s1697_s3 }
0x1018   :  { %v630_v24 = vpop.permute.xlu0 %629 }
0x1019   :  { %1369 = vmatmul.msk.f32.vlgmr.msra.gmra.mxu0 %vm146_vm5, %v630_v24 }
0x101a   :  { %1173 = vmatpush.msra.mxu0 %v747_v48 }
0x101c   :  { %1174 = vmatpush.msra.mxu0 %v746_v49 }
0x101e   :  { %1175 = vmatpush.msra.mxu0 %v745_v52 }
0x1020   :  { %1176 = vmatpush.msra.mxu0 %v744_v54 }
0x1096   :  { %v650_v25 = vpop.f32.mrf.mxu0 }
0x1097   :  { %v654_v26 = vrot.slane %v650_v25, 1 }
0x1099   :  { %v656_v27 = vadd.f32 %v654_v26, %v1772_v11 }
0x109b   :  { %1460 = vtanh.f32 %v656_v27  ;;  %v1370_v29 = vmul.f32 -1.442695, %v656_v27 }
0x109d   :  { %1462 = vpow2.f32 %v1370_v29 }
0x10a1   :  { %v1461_v28 = vpop.eup %1460 }
0x10a2   :  { %682 = vrot.lane.b32.xlu1 %v1461_v28, %s1696_s13 }
0x10a3   :  { %v1463_v30 = vpop.eup %1462 }
0x10a4   :  { %v660_v31 = vadd.f32 1.0, %v1463_v30 }
0x10a6   :  { %1464 = vrcp.f32 %v660_v31  ;;  %v672_v38 = vand.u32 2147483648, %v660_v31  ;;  %vm666_vm7 = vweird.f32 %v660_v31  ;;  %v670_v39 = vand.u32 2147483647, %v660_v31 }
0x10a8   :  { %v673_v40 = vor.u32 1.1754944e-38, %v672_v38  ;;  %vm671_vm9 = vcmp.eq.f32.partialorder %v670_v39, 8.507059e+37 }
0x10ac   :  { %v1465_v32 = vpop.eup %1464 }
0x10ad   :  { %v662_v33 = vmul.f32 %v1465_v32, %v660_v31  ;;  %vm667_vm6 = vweird.f32 %v1465_v32 }
0x10ae   :  { %vm668_vm8 = vmor %vm666_vm7, %vm667_vm6 }
0x10af   :  { %v663_v34 = vsub.f32 1.0, %v662_v33 }
0x10b1   :  { %v664_v36 = vmul.f32 %v1465_v32, %v663_v34 }
0x10b3   :  { %v665_v37 = vadd.f32 %v1465_v32, %v664_v36 }
0x10b5   :  { %v669_v11 = vsel %vm668_vm8, %v1465_v32, %v665_v37 }
0x10b6   :  { %v674_v41 = vsel %vm671_vm9, %v673_v40, %v669_v11 }
0x10b7   :  { %v680_v44 = vmul.f32 %v678_v43, %v674_v41 }
0x1114   :  { %v683_v35 = vpop.permute.xlu1 %682 }
0x1115   :  { %v685_v42 = vmul.f32 %v683_v35, %v674_v41 }
0x1117   :  { %687 = vrot.lane.b32.xlu2 %v685_v42, %s1697_s3 }
0x1171   :  { %v688_v45 = vpop.permute.xlu2 %687 }
0x1172   :  { %v690_v46 = vadd.f32 %v688_v45, %v680_v44 }
0x1174   :  { %1466 = vtanh.f32 %v690_v46 }
0x117a   :  { %v1467_v47 = vpop.eup %1466 }
0x117b   :  { %693 = vrot.lane.b32.xlu0 %v1467_v47, %s1696_s13 }
0x11ed   :  { %v694_v56 = vpop.permute.xlu0 %693 }
0x11ee   :  { %v696_v8 = vmul.f32 %v694_v56, %v674_v41 }
0x11f0   :  { %v710_v57 = vsel %vm709_vm10, %v1818_v23, %v696_v8 }
0x11f1   :  { %720 = vrot.lane.b32.xlu1 %v710_v57, %s1697_s3 }
0x1263   :  { %v721_v58 = vpop.permute.xlu1 %720 }
0x1264   :  { %1371 = vmatmul.msk.f32.vlgmr.msra.gmra.mxu1 %vm146_vm5, %v721_v58 }
0x1265   :  { %1243 = vmatpush.msra.mxu1 %v747_v48 }
0x1267   :  { %1244 = vmatpush.msra.mxu1 %v746_v49 }
0x1269   :  { %1245 = vmatpush.msra.mxu1 %v745_v52 }
0x126b   :  { %1246 = vmatpush.msra.mxu1 %v744_v54 }
0x12e1   :  { %v741_v60 = vpop.f32.mrf.mxu1 }
0x12e2   :  { %v1833_v62 = vadd.f32 %v1401_v59, %v741_v60 }
0x12e4   :  { %v768_v63 = vadd.f32 %v765_v61, %v1833_v62 }
0x12e6   :  { %1468 = vtanh.f32 %v768_v63  ;;  %v1372_v1 = vmul.f32 -1.442695, %v768_v63 }
0x12e8   :  { %1470 = vpow2.f32 %v1372_v1 }
0x12ec   :  { %v1469_v0 = vpop.eup %1468 }
0x12ed   :  { %791 = vrot.lane.b32.xlu2 %v1469_v0, %s1696_s13 }
0x12ee   :  { %v1471_v2 = vpop.eup %1470 }
0x12ef   :  { %v772_v3 = vadd.f32 1.0, %v1471_v2 }
0x12f1   :  { %1472 = vrcp.f32 %v772_v3  ;;  %v784_v10 = vand.u32 2147483648, %v772_v3  ;;  %vm778_vm12 = vweird.f32 %v772_v3  ;;  %v782_v12 = vand.u32 2147483647, %v772_v3 }
0x12f3   :  { %v785_v14 = vor.u32 1.1754944e-38, %v784_v10  ;;  %vm783_vm14 = vcmp.eq.f32.partialorder %v782_v12, 8.507059e+37 }
0x12f7   :  { %v1473_v4 = vpop.eup %1472 }
0x12f8   :  { %v774_v5 = vmul.f32 %v1473_v4, %v772_v3  ;;  %vm779_vm11 = vweird.f32 %v1473_v4 }
0x12f9   :  { %vm780_vm13 = vmor %vm778_vm12, %vm779_vm11 }
0x12fa   :  { %v775_v6 = vsub.f32 1.0, %v774_v5 }
0x12fc   :  { %v776_v7 = vmul.f32 %v1473_v4, %v775_v6 }
0x12fe   :  { %v777_v9 = vadd.f32 %v1473_v4, %v776_v7 }
0x1300   :  { %v781_v13 = vsel %vm780_vm13, %v1473_v4, %v777_v9 }
0x1301   :  { %v786_v16 = vsel %vm783_vm14, %v785_v14, %v781_v13 }
0x1302   :  { %v789_v18 = vmul.f32 0.0, %v786_v16 }
0x1347   :  { %v792_v15 = vpop.permute.xlu2 %791 }
0x1348   :  { %v794_v17 = vmul.f32 %v792_v15, %v786_v16 }
0x134a   :  { %796 = vrot.lane.b32.xlu0 %v794_v17, %s1697_s3 }
0x13bc   :  { %v797_v19 = vpop.permute.xlu0 %796 }
0x13bd   :  { %v799_v20 = vadd.f32 %v797_v19, %v789_v18 }
0x13bf   :  { %1474 = vtanh.f32 %v799_v20  ;;  %v856_v43 = vrot.slane %v799_v20, 7 }
0x13c5   :  { %v1475_v21 = vpop.eup %1474 }
0x13c6   :  { %802 = vrot.lane.b32.xlu1 %v1475_v21, %s1696_s13 }
0x1438   :  { %v803_v22 = vpop.permute.xlu1 %802 }
0x1439   :  { %v805_v23 = vmul.f32 %v803_v22, %v786_v16 }
0x143b   :  { %807 = vrot.lane.b32.xlu2 %v805_v23, %s1697_s3 }
0x1495   :  { %v808_v24 = vpop.permute.xlu2 %807 }
0x1496   :  { %1373 = vmatmul.msk.f32.vlgmr.msra.gmra.mxu3 %vm146_vm5, %v808_v24 }
0x1519   :  { %v828_v25 = vpop.f32.mrf.mxu3 }
0x151a   :  { %v832_v26 = vrot.slane %v828_v25, 7 }
0x151c   :  { %v834_v27 = vadd.f32 %v832_v26, %v1833_v62 }
0x151e   :  { %1476 = vtanh.f32 %v834_v27  ;;  %v1374_v29 = vmul.f32 -1.442695, %v834_v27 }
0x1520   :  { %1478 = vpow2.f32 %v1374_v29 }
0x1524   :  { %v1477_v28 = vpop.eup %1476 }
0x1525   :  { %860 = vrot.lane.b32.xlu0 %v1477_v28, %s1696_s13 }
0x1526   :  { %v1479_v30 = vpop.eup %1478 }
0x1527   :  { %v838_v31 = vadd.f32 1.0, %v1479_v30 }
0x1529   :  { %1480 = vrcp.f32 %v838_v31  ;;  %v850_v38 = vand.u32 2147483648, %v838_v31  ;;  %vm844_vm0 = vweird.f32 %v838_v31  ;;  %v848_v39 = vand.u32 2147483647, %v838_v31 }
0x152b   :  { %v851_v40 = vor.u32 1.1754944e-38, %v850_v38  ;;  %vm849_vm2 = vcmp.eq.f32.partialorder %v848_v39, 8.507059e+37 }
0x152f   :  { %v1481_v32 = vpop.eup %1480 }
0x1530   :  { %v840_v33 = vmul.f32 %v1481_v32, %v838_v31  ;;  %vm845_vm15 = vweird.f32 %v1481_v32 }
0x1531   :  { %vm846_vm1 = vmor %vm844_vm0, %vm845_vm15 }
0x1532   :  { %v841_v34 = vsub.f32 1.0, %v840_v33 }
0x1534   :  { %v842_v36 = vmul.f32 %v1481_v32, %v841_v34 }
0x1536   :  { %v843_v37 = vadd.f32 %v1481_v32, %v842_v36 }
0x1538   :  { %v847_v11 = vsel %vm846_vm1, %v1481_v32, %v843_v37 }
0x1539   :  { %v852_v41 = vsel %vm849_vm2, %v851_v40, %v847_v11 }
0x153a   :  { %v858_v44 = vmul.f32 %v856_v43, %v852_v41 }
0x1597   :  { %v861_v35 = vpop.permute.xlu0 %860 }
0x1598   :  { %v863_v42 = vmul.f32 %v861_v35, %v852_v41 }
0x159a   :  { %865 = vrot.lane.b32.xlu1 %v863_v42, %s1697_s3 }
0x160c   :  { %v866_v45 = vpop.permute.xlu1 %865 }
0x160d   :  { %v868_v46 = vadd.f32 %v866_v45, %v858_v44 }
0x160f   :  { %1482 = vtanh.f32 %v868_v46  ;;  %v926_v7 = vrot.slane %v868_v46, 7 }
0x1615   :  { %v1483_v47 = vpop.eup %1482 }
0x1616   :  { %871 = vrot.lane.b32.xlu2 %v1483_v47, %s1696_s13 }
0x1670   :  { %v872_v48 = vpop.permute.xlu2 %871 }
0x1671   :  { %v874_v49 = vmul.f32 %v872_v48, %v852_v41 }
0x1673   :  { %v876_v50 = vrot.slane %v874_v49, 1 }
0x1675   :  { %877 = vrot.lane.b32.xlu0 %v876_v50, %s1697_s3 }
0x16e7   :  { %v878_v51 = vpop.permute.xlu0 %877 }
0x16e8   :  { %1375 = vmatmul.msk.f32.vlgmr.msrb.gmra.mxu0 %vm146_vm5, %v878_v51 }
0x1765   :  { %v898_v52 = vpop.f32.mrf.mxu0 }
0x1766   :  { %v902_v53 = vrot.slane %v898_v52, 6 }
0x1768   :  { %v904_v54 = vadd.f32 %v902_v53, %v1833_v62 }
0x176a   :  { %1484 = vtanh.f32 %v904_v54  ;;  %v1376_v56 = vmul.f32 -1.442695, %v904_v54 }
0x176c   :  { %1486 = vpow2.f32 %v1376_v56 }
0x1770   :  { %v1485_v55 = vpop.eup %1484 }
0x1771   :  { %930 = vrot.lane.b32.xlu1 %v1485_v55, %s1696_s13 }
0x1772   :  { %v1487_v8 = vpop.eup %1486 }
0x1773   :  { %v908_v57 = vadd.f32 1.0, %v1487_v8 }
0x1775   :  { %1488 = vrcp.f32 %v908_v57  ;;  %v920_v0 = vand.u32 2147483648, %v908_v57  ;;  %vm914_vm4 = vweird.f32 %v908_v57  ;;  %v918_v1 = vand.u32 2147483647, %v908_v57 }
0x1777   :  { %v921_v3 = vor.u32 1.1754944e-38, %v920_v0  ;;  %vm919_vm7 = vcmp.eq.f32.partialorder %v918_v1, 8.507059e+37 }
0x177b   :  { %v1489_v58 = vpop.eup %1488 }
0x177c   :  { %v910_v59 = vmul.f32 %v1489_v58, %v908_v57  ;;  %vm915_vm3 = vweird.f32 %v1489_v58 }
0x177d   :  { %vm916_vm6 = vmor %vm914_vm4, %vm915_vm3 }
0x177e   :  { %v911_v60 = vsub.f32 1.0, %v910_v59 }
0x1780   :  { %v912_v61 = vmul.f32 %v1489_v58, %v911_v60 }
0x1782   :  { %v913_v63 = vadd.f32 %v1489_v58, %v912_v61 }
0x1784   :  { %v917_v2 = vsel %vm916_vm6, %v1489_v58, %v913_v63 }
0x1785   :  { %v922_v5 = vsel %vm919_vm7, %v921_v3, %v917_v2 }
0x1786   :  { %v928_v9 = vmul.f32 %v926_v7, %v922_v5 }
0x17e3   :  { %v931_v4 = vpop.permute.xlu1 %930 }
0x17e4   :  { %v933_v6 = vmul.f32 %v931_v4, %v922_v5 }
0x17e6   :  { %935 = vrot.lane.b32.xlu2 %v933_v6, %s1697_s3 }
0x1840   :  { %v936_v10 = vpop.permute.xlu2 %935 }
0x1841   :  { %v938_v12 = vadd.f32 %v936_v10, %v928_v9 }
0x1843   :  { %1490 = vtanh.f32 %v938_v12  ;;  %v996_v38 = vrot.slane %v938_v12, 7 }
0x1849   :  { %v1491_v13 = vpop.eup %1490 }
0x184a   :  { %941 = vrot.lane.b32.xlu0 %v1491_v13, %s1696_s13 }
0x18bc   :  { %v942_v14 = vpop.permute.xlu0 %941 }
0x18bd   :  { %v944_v15 = vmul.f32 %v942_v14, %v922_v5 }
0x18bf   :  { %v946_v16 = vrot.slane %v944_v15, 2 }
0x18c1   :  { %947 = vrot.lane.b32.xlu1 %v946_v16, %s1697_s3 }
0x1933   :  { %v948_v17 = vpop.permute.xlu1 %947 }
0x1934   :  { %1377 = vmatmul.msk.f32.vlgmr.msrb.gmra.mxu1 %vm146_vm5, %v948_v17 }
0x19b1   :  { %v968_v18 = vpop.f32.mrf.mxu1 }
0x19b2   :  { %v972_v19 = vrot.slane %v968_v18, 5 }
0x19b4   :  { %v974_v20 = vadd.f32 %v972_v19, %v1833_v62 }
0x19b6   :  { %1492 = vtanh.f32 %v974_v20  ;;  %v1378_v22 = vmul.f32 -1.442695, %v974_v20 }
0x19b8   :  { %1494 = vpow2.f32 %v1378_v22 }
0x19bc   :  { %v1493_v21 = vpop.eup %1492 }
0x19bd   :  { %1000 = vrot.lane.b32.xlu2 %v1493_v21, %s1696_s13 }
0x19be   :  { %v1495_v23 = vpop.eup %1494 }
0x19bf   :  { %v978_v24 = vadd.f32 1.0, %v1495_v23 }
0x19c1   :  { %1496 = vrcp.f32 %v978_v24  ;;  %v990_v30 = vand.u32 2147483648, %v978_v24  ;;  %vm984_vm9 = vweird.f32 %v978_v24  ;;  %v988_v31 = vand.u32 2147483647, %v978_v24 }
0x19c3   :  { %v991_v33 = vor.u32 1.1754944e-38, %v990_v30  ;;  %vm989_vm11 = vcmp.eq.f32.partialorder %v988_v31, 8.507059e+37 }
0x19c7   :  { %v1497_v25 = vpop.eup %1496 }
0x19c8   :  { %v980_v26 = vmul.f32 %v1497_v25, %v978_v24  ;;  %vm985_vm8 = vweird.f32 %v1497_v25 }
0x19c9   :  { %vm986_vm10 = vmor %vm984_vm9, %vm985_vm8 }
0x19ca   :  { %v981_v27 = vsub.f32 1.0, %v980_v26 }
0x19cc   :  { %v982_v28 = vmul.f32 %v1497_v25, %v981_v27 }
0x19ce   :  { %v983_v29 = vadd.f32 %v1497_v25, %v982_v28 }
0x19d0   :  { %v987_v32 = vsel %vm986_vm10, %v1497_v25, %v983_v29 }
0x19d1   :  { %v992_v36 = vsel %vm989_vm11, %v991_v33, %v987_v32 }
0x19d2   :  { %v998_v39 = vmul.f32 %v996_v38, %v992_v36 }
0x1a17   :  { %v1001_v34 = vpop.permute.xlu2 %1000 }
0x1a18   :  { %v1003_v37 = vmul.f32 %v1001_v34, %v992_v36 }
0x1a1a   :  { %1005 = vrot.lane.b32.xlu0 %v1003_v37, %s1697_s3 }
0x1a8c   :  { %v1006_v11 = vpop.permute.xlu0 %1005 }
0x1a8d   :  { %v1008_v40 = vadd.f32 %v1006_v11, %v998_v39 }
0x1a8f   :  { %1498 = vtanh.f32 %v1008_v40  ;;  %v1066_v0 = vrot.slane %v1008_v40, 7 }
0x1a95   :  { %v1499_v35 = vpop.eup %1498 }
0x1a96   :  { %1011 = vrot.lane.b32.xlu1 %v1499_v35, %s1696_s13 }
0x1b08   :  { %v1012_v41 = vpop.permute.xlu1 %1011 }
0x1b09   :  { %v1014_v42 = vmul.f32 %v1012_v41, %v992_v36 }
0x1b0b   :  { %v1016_v43 = vrot.slane %v1014_v42, 3 }
0x1b0d   :  { %1017 = vrot.lane.b32.xlu2 %v1016_v43, %s1697_s3 }
0x1b67   :  { %v1018_v44 = vpop.permute.xlu2 %1017 }
0x1b68   :  { %1379 = vmatmul.msk.f32.vlgmr.msrb.gmra.mxu2 %vm146_vm5, %v1018_v44 }
0x1beb   :  { %v1038_v45 = vpop.f32.mrf.mxu2 }
0x1bec   :  { %v1042_v46 = vrot.slane %v1038_v45, 4 }
0x1bee   :  { %v1044_v47 = vadd.f32 %v1042_v46, %v1833_v62 }
0x1bf0   :  { %1500 = vtanh.f32 %v1044_v47  ;;  %v1380_v49 = vmul.f32 -1.442695, %v1044_v47 }
0x1bf2   :  { %1502 = vpow2.f32 %v1380_v49 }
0x1bf6   :  { %v1501_v48 = vpop.eup %1500 }
0x1bf7   :  { %1070 = vrot.lane.b32.xlu0 %v1501_v48, %s1696_s13 }
0x1bf8   :  { %v1503_v50 = vpop.eup %1502 }
0x1bf9   :  { %v1048_v51 = vadd.f32 1.0, %v1503_v50 }
0x1bfb   :  { %1504 = vrcp.f32 %v1048_v51  ;;  %v1060_v8 = vand.u32 2147483648, %v1048_v51  ;;  %vm1054_vm13 = vweird.f32 %v1048_v51  ;;  %v1058_v57 = vand.u32 2147483647, %v1048_v51 }
0x1bfd   :  { %v1061_v59 = vor.u32 1.1754944e-38, %v1060_v8  ;;  %vm1059_vm15 = vcmp.eq.f32.partialorder %v1058_v57, 8.507059e+37 }
0x1c01   :  { %v1505_v52 = vpop.eup %1504 }
0x1c02   :  { %v1050_v53 = vmul.f32 %v1505_v52, %v1048_v51  ;;  %vm1055_vm12 = vweird.f32 %v1505_v52 }
0x1c03   :  { %vm1056_vm14 = vmor %vm1054_vm13, %vm1055_vm12  ;;  %vm1306_vm12 = vcmask 261127  }
0x1c04   :  { %v1051_v54 = vsub.f32 1.0, %v1050_v53 }
0x1c06   :  { %v1052_v55 = vmul.f32 %v1505_v52, %v1051_v54 }
0x1c08   :  { %v1053_v56 = vadd.f32 %v1505_v52, %v1052_v55 }
0x1c0a   :  { %v1057_v58 = vsel %vm1056_vm14, %v1505_v52, %v1053_v56 }
0x1c0b   :  { %v1062_v61 = vsel %vm1059_vm15, %v1061_v59, %v1057_v58 }
0x1c0c   :  { %v1068_v1 = vmul.f32 %v1066_v0, %v1062_v61 }
0x1c69   :  { %v1071_v60 = vpop.permute.xlu0 %1070 }
0x1c6a   :  { %v1073_v63 = vmul.f32 %v1071_v60, %v1062_v61 }
0x1c6c   :  { %1075 = vrot.lane.b32.xlu1 %v1073_v63, %s1697_s3 }
0x1cde   :  { %v1076_v2 = vpop.permute.xlu1 %1075 }
0x1cdf   :  { %v1078_v3 = vadd.f32 %v1076_v2, %v1068_v1 }
0x1ce1   :  { %1506 = vtanh.f32 %v1078_v3  ;;  %v1136_v30 = vrot.slane %v1078_v3, 7 }
0x1ce7   :  { %v1507_v4 = vpop.eup %1506 }
0x1ce8   :  { %1081 = vrot.lane.b32.xlu2 %v1507_v4, %s1696_s13 }
0x1d42   :  { %v1082_v5 = vpop.permute.xlu2 %1081 }
0x1d43   :  { %v1084_v6 = vmul.f32 %v1082_v5, %v1062_v61 }
0x1d45   :  { %v1086_v7 = vrot.slane %v1084_v6, 4 }
0x1d47   :  { %1087 = vrot.lane.b32.xlu0 %v1086_v7, %s1697_s3 }
0x1db9   :  { %v1088_v9 = vpop.permute.xlu0 %1087 }
0x1dba   :  { %1381 = vmatmul.msk.f32.vlgmr.msrb.gmra.mxu3 %vm146_vm5, %v1088_v9 }
0x1e3d   :  { %v1108_v10 = vpop.f32.mrf.mxu3 }
0x1e3e   :  { %v1112_v12 = vrot.slane %v1108_v10, 3  ;;  %v1402_v10 = vld [vmem:[%s1895_s7] ss:$0 sm:$0xff]  ;;  %s1699_s7 = smov [#allocation12]  }
0x1e3f   :  { %s1341_s18 = sshll.u32 %s1699_s7, 4  ;;  %s1342_s18 = int_to_ptr.vmem [resolvable:$true] %s1341_s18 }
0x1e40   :  { %v1114_v13 = vadd.f32 %v1112_v12, %v1833_v62 }
0x1e42   :  { %1508 = vtanh.f32 %v1114_v13  ;;  %v1382_v15 = vmul.f32 -1.442695, %v1114_v13 }
0x1e44   :  { %1510 = vpow2.f32 %v1382_v15 }
0x1e48   :  { %v1509_v14 = vpop.eup %1508 }
0x1e49   :  { %1140 = vrot.lane.b32.xlu1 %v1509_v14, %s1696_s13 }
0x1e4a   :  { %v1511_v16 = vpop.eup %1510 }
0x1e4b   :  { %v1118_v17 = vadd.f32 1.0, %v1511_v16 }
0x1e4d   :  { %1512 = vrcp.f32 %v1118_v17  ;;  %v1130_v23 = vand.u32 2147483648, %v1118_v17  ;;  %vm1124_vm1 = vweird.f32 %v1118_v17  ;;  %v1128_v24 = vand.u32 2147483647, %v1118_v17 }
0x1e4f   :  { %v1131_v26 = vor.u32 1.1754944e-38, %v1130_v23  ;;  %vm1129_vm3 = vcmp.eq.f32.partialorder %v1128_v24, 8.507059e+37 }
0x1e53   :  { %v1513_v18 = vpop.eup %1512 }
0x1e54   :  { %v1120_v19 = vmul.f32 %v1513_v18, %v1118_v17  ;;  %vm1125_vm0 = vweird.f32 %v1513_v18 }
0x1e55   :  { %vm1126_vm2 = vmor %vm1124_vm1, %vm1125_vm0  ;;  %vm1334_vm0 = vcmask 7175  }
0x1e56   :  { %v1121_v20 = vsub.f32 1.0, %v1120_v19 }
0x1e58   :  { %v1122_v21 = vmul.f32 %v1513_v18, %v1121_v20 }
0x1e5a   :  { %v1123_v22 = vadd.f32 %v1513_v18, %v1122_v21 }
0x1e5c   :  { %v1127_v25 = vsel %vm1126_vm2, %v1513_v18, %v1123_v22 }
0x1e5d   :  { %v1132_v28 = vsel %vm1129_vm3, %v1131_v26, %v1127_v25 }
0x1e5e   :  { %v1138_v31 = vmul.f32 %v1136_v30, %v1132_v28 }
0x1ebb   :  { %v1141_v27 = vpop.permute.xlu1 %1140 }
0x1ebc   :  { %v1143_v29 = vmul.f32 %v1141_v27, %v1132_v28 }
0x1ebe   :  { %1145 = vrot.lane.b32.xlu2 %v1143_v29, %s1697_s3 }
0x1f18   :  { %v1146_v32 = vpop.permute.xlu2 %1145 }
0x1f19   :  { %v1148_v33 = vadd.f32 %v1146_v32, %v1138_v31 }
0x1f1b   :  { %1514 = vtanh.f32 %v1148_v33  ;;  %v1206_v8 = vrot.slane %v1148_v33, 7 }
0x1f21   :  { %v1515_v34 = vpop.eup %1514 }
0x1f22   :  { %1151 = vrot.lane.b32.xlu0 %v1515_v34, %s1696_s13  ;;  %v1403_v34 = vld [vmem:[#allocation2] ss:$0 sm:$0xff] }
0x1f94   :  { %v1152_v36 = vpop.permute.xlu0 %1151 }
0x1f95   :  { %v1154_v37 = vmul.f32 %v1152_v36, %v1132_v28 }
0x1f97   :  { %v1156_v38 = vrot.slane %v1154_v37, 5 }
0x1f99   :  { %1157 = vrot.lane.b32.xlu1 %v1156_v38, %s1697_s3 }
0x200b   :  { %v1158_v39 = vpop.permute.xlu1 %1157 }
0x200c   :  { %1383 = vmatmul.msk.f32.vlgmr.msra.gmra.mxu0 %vm146_vm5, %v1158_v39 }
0x2089   :  { %v1178_v11 = vpop.f32.mrf.mxu0 }
0x208a   :  { %v1182_v40 = vrot.slane %v1178_v11, 2 }
0x208c   :  { %v1184_v35 = vadd.f32 %v1182_v40, %v1833_v62 }
0x208e   :  { %1516 = vtanh.f32 %v1184_v35  ;;  %v1384_v42 = vmul.f32 -1.442695, %v1184_v35 }
0x2090   :  { %1518 = vpow2.f32 %v1384_v42 }
0x2094   :  { %v1517_v41 = vpop.eup %1516 }
0x2095   :  { %1210 = vrot.lane.b32.xlu2 %v1517_v41, %s1696_s13 }
0x2096   :  { %v1519_v43 = vpop.eup %1518 }
0x2097   :  { %v1188_v44 = vadd.f32 1.0, %v1519_v43 }
0x2099   :  { %1520 = vrcp.f32 %v1188_v44  ;;  %v1200_v50 = vand.u32 2147483648, %v1188_v44  ;;  %vm1194_vm6 = vweird.f32 %v1188_v44  ;;  %v1198_v51 = vand.u32 2147483647, %v1188_v44 }
0x209b   :  { %v1201_v53 = vor.u32 1.1754944e-38, %v1200_v50  ;;  %vm1199_vm8 = vcmp.eq.f32.partialorder %v1198_v51, 8.507059e+37 }
0x209f   :  { %v1521_v45 = vpop.eup %1520 }
0x20a0   :  { %v1190_v46 = vmul.f32 %v1521_v45, %v1188_v44  ;;  %vm1195_vm4 = vweird.f32 %v1521_v45 }
0x20a1   :  { %vm1196_vm7 = vmor %vm1194_vm6, %vm1195_vm4 }
0x20a2   :  { %v1191_v47 = vsub.f32 1.0, %v1190_v46 }
0x20a4   :  { %v1192_v48 = vmul.f32 %v1521_v45, %v1191_v47 }
0x20a6   :  { %v1193_v49 = vadd.f32 %v1521_v45, %v1192_v48 }
0x20a8   :  { %v1197_v52 = vsel %vm1196_vm7, %v1521_v45, %v1193_v49 }
0x20a9   :  { %v1202_v55 = vsel %vm1199_vm8, %v1201_v53, %v1197_v52 }
0x20aa   :  { %v1208_v57 = vmul.f32 %v1206_v8, %v1202_v55 }
0x20ef   :  { %v1211_v54 = vpop.permute.xlu2 %1210 }
0x20f0   :  { %v1213_v56 = vmul.f32 %v1211_v54, %v1202_v55 }
0x20f2   :  { %1215 = vrot.lane.b32.xlu0 %v1213_v56, %s1697_s3 }
0x2164   :  { %v1216_v58 = vpop.permute.xlu0 %1215 }
0x2165   :  { %v1218_v59 = vadd.f32 %v1216_v58, %v1208_v57 }
0x2167   :  { %1522 = vtanh.f32 %v1218_v59  ;;  %v1276_v23 = vrot.slane %v1218_v59, 7 }
0x216d   :  { %v1523_v60 = vpop.eup %1522 }
0x216e   :  { %1221 = vrot.lane.b32.xlu1 %v1523_v60, %s1696_s13 }
0x21e0   :  { %v1222_v61 = vpop.permute.xlu1 %1221 }
0x21e1   :  { %v1224_v63 = vmul.f32 %v1222_v61, %v1202_v55 }
0x21e3   :  { %v1226_v0 = vrot.slane %v1224_v63, 6 }
0x21e5   :  { %1227 = vrot.lane.b32.xlu2 %v1226_v0, %s1697_s3 }
0x223f   :  { %v1228_v1 = vpop.permute.xlu2 %1227 }
0x2240   :  { %1385 = vmatmul.msk.f32.vlgmr.msra.gmra.mxu1 %vm146_vm5, %v1228_v1 }
0x22bd   :  { %v1248_v2 = vpop.f32.mrf.mxu1 }
0x22be   :  { %v1252_v3 = vrot.slane %v1248_v2, 1 }
0x22c0   :  { %v1254_v4 = vadd.f32 %v1252_v3, %v1833_v62 }
0x22c2   :  { %1524 = vtanh.f32 %v1254_v4  ;;  %v1386_v6 = vmul.f32 -1.442695, %v1254_v4 }
0x22c4   :  { %1526 = vpow2.f32 %v1386_v6 }
0x22c8   :  { %v1525_v5 = vpop.eup %1524 }
0x22c9   :  { %1280 = vrot.lane.b32.xlu0 %v1525_v5, %s1696_s13 }
0x22ca   :  { %v1527_v7 = vpop.eup %1526 }
0x22cb   :  { %v1258_v9 = vadd.f32 1.0, %v1527_v7 }
0x22cd   :  { %1528 = vrcp.f32 %v1258_v9  ;;  %v1270_v16 = vand.u32 2147483648, %v1258_v9  ;;  %vm1264_vm9 = vweird.f32 %v1258_v9  ;;  %v1268_v17 = vand.u32 2147483647, %v1258_v9 }
0x22cf   :  { %v1271_v19 = vor.u32 1.1754944e-38, %v1270_v16  ;;  %vm1269_vm11 = vcmp.eq.f32.partialorder %v1268_v17, 8.507059e+37 }
0x22d1   :  { %1298 = vrot.lane.b32.xlu0 %v1402_v10, %s1698_s17 }
0x22d3   :  { %v1529_v12 = vpop.eup %1528 }
0x22d4   :  { %v1260_v13 = vmul.f32 %v1529_v12, %v1258_v9  ;;  %vm1265_vm5 = vweird.f32 %v1529_v12 }
0x22d5   :  { %vm1266_vm10 = vmor %vm1264_vm9, %vm1265_vm5 }
0x22d6   :  { %v1261_v14 = vsub.f32 1.0, %v1260_v13 }
0x22d8   :  { %v1262_v15 = vmul.f32 %v1529_v12, %v1261_v14 }
0x22da   :  { %v1263_v62 = vadd.f32 %v1529_v12, %v1262_v15 }
0x22dc   :  { %v1267_v18 = vsel %vm1266_vm10, %v1529_v12, %v1263_v62 }
0x22dd   :  { %v1272_v21 = vsel %vm1269_vm11, %v1271_v19, %v1267_v18 }
0x22de   :  { %v1278_v24 = vmul.f32 %v1276_v23, %v1272_v21 }
0x233b   :  { %v1281_v20 = vpop.permute.xlu0 %1280 }
0x233c   :  { %v1283_v22 = vmul.f32 %v1281_v20, %v1272_v21 }
0x233e   :  { %1285 = vrot.lane.b32.xlu1 %v1283_v22, %s1697_s3 }
0x2343   :  { %v1299_v29 = vpop.permute.xlu0 %1298 }
0x23b0   :  { %v1286_v25 = vpop.permute.xlu1 %1285 }
0x23b1   :  { %v1288_v26 = vadd.f32 %v1286_v25, %v1278_v24 }
0x23b3   :  { %1530 = vtanh.f32 %v1288_v26 }
0x23b9   :  { %v1531_v27 = vpop.eup %1530 }
0x23ba   :  { %1291 = vrot.lane.b32.xlu2 %v1531_v27, %s1696_s13 }
0x2414   :  { %v1292_v28 = vpop.permute.xlu2 %1291 }
0x2415   :  { %v1294_v30 = vmul.f32 %v1292_v28, %v1272_v21 }
0x2417   :  { %v1301_v31 = vmul.f32 %v1299_v29, %v1294_v30 }
0x2419   :  { %1303 = vrot.lane.b32.xlu1 %v1301_v31, %s1697_s3 }
0x248b   :  { %v1304_v32 = vpop.permute.xlu1 %1303 }
0x248c   :  { %v1307_v33 = vsel %vm1306_vm12, %v1304_v32, 0.0 }
0x248d   :  { %1308 = vadd.xlane.f32.xlu2 %v1307_v33 }
0x2500   :  { %v1309_v36 = vpop.xlane.xlu2 %1308 }
0x2501   :  { %v1314_v37 = vadd.f32 %v1403_v34, %v1309_v36 }
0x2503   :  { %v1387_v38 = vmul.f32 -1.442695, %v1314_v37 }
0x2505   :  { %1532 = vpow2.f32 %v1387_v38 }
0x250b   :  { %v1533_v39 = vpop.eup %1532 }
0x250c   :  { %v1318_v11 = vadd.f32 1.0, %v1533_v39 }
0x250e   :  { %1534 = vrcp.f32 %v1318_v11  ;;  %v1330_v42 = vand.u32 2147483648, %v1318_v11  ;;  %v1328_v44 = vand.u32 2147483647, %v1318_v11  ;;  %vm1324_vm14 = vweird.f32 %v1318_v11 }
0x2510   :  { %v1331_v46 = vor.u32 1.1754944e-38, %v1330_v42  ;;  %vm1329_vm1 = vcmp.eq.f32.partialorder %v1328_v44, 8.507059e+37 }
0x2514   :  { %v1535_v40 = vpop.eup %1534 }
0x2515   :  { %v1320_v35 = vmul.f32 %v1535_v40, %v1318_v11  ;;  %vm1325_vm13 = vweird.f32 %v1535_v40 }
0x2516   :  { %vm1326_vm15 = vmor %vm1324_vm14, %vm1325_vm13 }
0x2517   :  { %v1321_v41 = vsub.f32 1.0, %v1320_v35 }
0x2519   :  { %v1322_v43 = vmul.f32 %v1535_v40, %v1321_v41 }
0x251b   :  { %v1323_v45 = vadd.f32 %v1535_v40, %v1322_v43 }
0x251d   :  { %v1327_v47 = vsel %vm1326_vm15, %v1535_v40, %v1323_v45 }
0x251e   :  { %v1332_v48 = vsel %vm1329_vm1, %v1331_v46, %v1327_v47 }
0x251f   :  { %1335 = vst.msk [vmem:[#allocation12 - $0x7] sm:$0x80] %vm1334_vm0, %v1332_v48 }
0x2520   :  { %1346 = dma.vmem_to_hbm [thread:$0]  %s1342_s18, 16, %s1344_s8, [#allocation5]  }
0x2521   :  { %1686 = dma.done.wait [#allocation5], 16  }
0x2522   :  { %1687 = vsyncadd [#allocation5], 4294967280 }
0x2523   :  { %1351 = vsyncpa [#allocation4], 1 }
0x2524   :  { %1352 = vsyncpa [#allocation7], 1 }
0x2525   :  { %1353 = vsyncpa [#allocation10], 1 }
0x2526   :  { %1354 = vsyncpa [#allocation5], 1 }

</bundles_post_ra>
